<compile_context>
chip_gen: v7x
topology: tpu7x:2x2x1
jax: 0.10.0
libtpu: 0.0.40
codegen_flags: <defaults>
</compile_context>

<pallas_src>
import jax
import jax.numpy as jnp
from jax.experimental import pallas as pl
from jax.experimental.pallas import tpu as pltpu

LOB_DEPTH = 5
LOB_FIELDS = 4
NEWS_DIM = 384
VIT_HIDDEN = 768

CONV_OUT = 32
KH, KW = 3, 2
OUT_H = LOB_DEPTH              # padding (1,0) keeps H = 5
OUT_W = LOB_FIELDS - KW + 1    # 3
N_PATCH = OUT_H * OUT_W        # 15
PATCH_K = KH * KW              # 6
PATCH_KP = 8                   # K zero-padded to 8 for clean sublane/lane layout


# ----------------------------- Pallas kernel ------------------------------ #
def _fused_kernel(img_ref, lobp_ref, text_ref,
                  wc_ref, bc_ref,
                  wimg_ref, wlob_ref, wtext_ref, bfold_ref,
                  wf2_ref, bf2_ref,
                  out_ref):
    f32 = jnp.float32
    bf16 = jnp.bfloat16
    bt = out_ref.shape[0]                     # batch tile (static)

    # ---- LOB branch: Conv2d(1,32,(3,2),pad=(1,0)) as 15 unrolled patch matmuls,
    #      ReLU, then global average pool over the 15 spatial positions. ----
    wc = wc_ref[...]                          # [8, 32] f32 (taps zero-padded 6->8)
    bc = bc_ref[...]                          # [1, 32] f32
    pooled = jnp.zeros((bt, CONV_OUT), f32)
    for p in range(N_PATCH):                  # static unroll (15 tiny matmuls)
        cp = jnp.dot(lobp_ref[p], wc, preferred_element_type=f32) + bc
        pooled = pooled + jnp.maximum(cp, 0.0)
    pooled = pooled * (1.0 / N_PATCH)         # [bt, 32] f32

    # ---- Fusion layer 1 with vit_proj / lob-Linear / text_proj pre-folded into its
    #      weight (no nonlinearity between them, so the fold is exact algebra). ----
    h = jnp.dot(img_ref[...].astype(bf16), wimg_ref[...], preferred_element_type=f32)
    h = h + jnp.dot(pooled.astype(bf16), wlob_ref[...], preferred_element_type=f32)
    h = h + jnp.dot(text_ref[...].astype(bf16), wtext_ref[...], preferred_element_type=f32)
    h = jnp.maximum(h + bfold_ref[...], 0.0)  # f32 bias add + ReLU

    # TODO(synk): nn.Dropout(0.2) is identity at inference; not applied here.
    out_ref[...] = (jnp.dot(h.astype(bf16), wf2_ref[...], preferred_element_type=f32)
                    + bf2_ref[...]).astype(out_ref.dtype)


# ------------------------------ JAX glue ---------------------------------- #
def _round_up(x, m):
    return ((x + m - 1) // m) * m


def _im2col_lob(lob, b_pad):
    """lob: [B, 5, 4] -> patch-major im2col [15, B_pad, 8] (K zero-padded 6 -> 8)."""
    B = lob.shape[0]
    padded = jnp.pad(lob, ((0, b_pad - B), (1, 1), (0, 0)))   # pad batch + H
    cols = []
    for oh in range(OUT_H):
        for ow in range(OUT_W):
            cols.append(padded[:, oh:oh + KH, ow:ow + KW].reshape(b_pad, PATCH_K))
    patches = jnp.stack(cols, axis=0)                          # [15, B_pad, 6]
    return jnp.pad(patches, ((0, 0), (0, 0), (0, PATCH_KP - PATCH_K)))


def init_params(key, latent_dim=512):
    """Raw parameters matching the PyTorch module layout (all f32)."""
    def lin(k, fan_in, fan_out):
        kw, kb = jax.random.split(k)
        bound = 1.0 / jnp.sqrt(float(fan_in))
        w = jax.random.uniform(kw, (fan_in, fan_out), jnp.float32, -bound, bound)
        b = jax.random.uniform(kb, (1, fan_out), jnp.float32, -bound, bound)
        return w, b

    ks = jax.random.split(key, 6)
    wv, bv = lin(ks[0], VIT_HIDDEN, latent_dim)           # vit_proj
    wc, bc = lin(ks[1], PATCH_K, CONV_OUT)                # Conv2d(1,32,(3,2)) as [6,32]
    wl, bl = lin(ks[2], CONV_OUT, latent_dim)             # lob Linear(32, latent)
    wt, bt = lin(ks[3], NEWS_DIM, latent_dim)             # text_proj
    wf1, bf1 = lin(ks[4], latent_dim * 3, latent_dim)     # fusion Linear(3*latent, latent)
    wf2, bf2 = lin(ks[5], latent_dim, latent_dim)         # fusion Linear(latent, latent)
    return dict(wv=wv, bv=bv, wc=wc, bc=bc, wl=wl, bl=bl, wt=wt, bt=bt,
                wf1=wf1, bf1=bf1, wf2=wf2, bf2=bf2)


def prepare_params(p):
    """Fold the three projections into fusion layer 1 (exact) and cast big weights to bf16.
    Do this ONCE offline; the folded dict is what the kernel consumes every call."""
    latent = p["wf2"].shape[1]
    f1 = p["wf1"]
    f1_img, f1_lob, f1_text = f1[:latent], f1[latent:2 * latent], f1[2 * latent:3 * latent]
    w_img = p["wv"] @ f1_img                                   # [768, latent]
    w_lob = p["wl"] @ f1_lob                                   # [32, latent]
    w_text = p["wt"] @ f1_text                                 # [384, latent]
    b_fold = p["bv"] @ f1_img + p["bl"] @ f1_lob + p["bt"] @ f1_text + p["bf1"]
    wc_pad = jnp.pad(p["wc"], ((0, PATCH_KP - PATCH_K), (0, 0)))   # [8, 32]
    bf16 = jnp.bfloat16
    return dict(
        wc=wc_pad, bc=p["bc"],                                 # tiny conv weight stays f32
        wimg=w_img.astype(bf16), wlob=w_lob.astype(bf16), wtext=w_text.astype(bf16),
        bfold=b_fold,                                          # f32
        wf2=p["wf2"].astype(bf16), bf2=p["bf2"])               # bias f32


def multimodal_encode(img_feat, lob, text_feat, fp):
    B = img_feat.shape[0]
    latent = fp["wf2"].shape[1]

    # Batch tiling: multiple of 8 sublanes, capped at 128 rows per grid step.
    b_tile = min(128, _round_up(B, 8))
    b_pad = _round_up(B, b_tile)
    grid = (b_pad // b_tile,)

    img_p = jnp.pad(img_feat, ((0, b_pad - B), (0, 0)))
    text_p = jnp.pad(text_feat, ((0, b_pad - B), (0, 0)))
    lobp = _im2col_lob(lob, b_pad)                             # [15, B_pad, 8]

    # TODO(synk): the reference's AdaptiveAvgPool2d((1,32)) + Flatten would produce 1024
    # features and fail against Linear(32, latent); implemented as the intended global
    # average pool over spatial positions.

    args = (img_p, lobp, text_p,
            fp["wc"], fp["bc"],
            fp["wimg"], fp["wlob"], fp["wtext"], fp["bfold"],
            fp["wf2"], fp["bf2"])

    def w_spec(arr):        # weights: full block, resident in VMEM across all grid steps
        return pl.BlockSpec(arr.shape, lambda i: (0, 0))

    in_specs = [
        pl.BlockSpec((b_tile, VIT_HIDDEN), lambda i: (i, 0)),         # img features
        pl.BlockSpec((N_PATCH, b_tile, PATCH_KP), lambda i: (0, i, 0)),  # LOB patches
        pl.BlockSpec((b_tile, NEWS_DIM), lambda i: (i, 0)),           # text features
    ] + [w_spec(a) for a in args[3:]]

    out = pl.pallas_call(
        _fused_kernel,
        out_shape=jax.ShapeDtypeStruct((b_pad, latent), jnp.float32),
        grid=grid,
        in_specs=in_specs,
        out_specs=pl.BlockSpec((b_tile, latent), lambda i: (i, 0)),
        compiler_params=pltpu.CompilerParams(
            dimension_semantics=("parallel",)),
    )(*args)
    return out[:B]


# --------------------------- pure-JAX reference ---------------------------- #
def reference(img_feat, lob, text_feat, p):
    B = img_feat.shape[0]
    img_vec = img_feat @ p["wv"] + p["bv"]
    padded = jnp.pad(lob, ((0, 0), (1, 1), (0, 0)))
    cols = []
    for oh in range(OUT_H):
        for ow in range(OUT_W):
            cols.append(padded[:, oh:oh + KH, ow:ow + KW].reshape(B, PATCH_K))
    patches = jnp.stack(cols, axis=1).reshape(B * N_PATCH, PATCH_K)
    conv = jnp.maximum(patches @ p["wc"] + p["bc"], 0.0)
    pooled = conv.reshape(B, N_PATCH, CONV_OUT).mean(axis=1)
    lob_vec = pooled @ p["wl"] + p["bl"]
    text_vec = text_feat @ p["wt"] + p["bt"]
    fused = jnp.concatenate([img_vec, lob_vec, text_vec], axis=-1)
    h = jnp.maximum(fused @ p["wf1"] + p["bf1"], 0.0)
    return h @ p["wf2"] + p["bf2"]


if __name__ == "__main__":
    B = 2
    LATENT = 512

    key = jax.random.PRNGKey(0)
    k_img, k_lob, k_text, k_param = jax.random.split(key, 4)

    # ViT pooler output and sentence-transformer embedding are modeled as inputs.
    img_feat = jax.random.normal(k_img, (B, VIT_HIDDEN), jnp.float32)
    lob = jax.random.normal(k_lob, (B, LOB_DEPTH, LOB_FIELDS), jnp.float32)
    text_feat = jax.random.normal(k_text, (B, NEWS_DIM), jnp.float32)

    params = init_params(k_param, LATENT)
    fused_params = prepare_params(params)      # one-time offline fold + bf16 cast

    out = multimodal_encode(img_feat, lob, text_feat, fused_params)
    out = jax.block_until_ready(out)

    ref = reference(img_feat, lob, text_feat, params)
    assert out.shape == (B, LATENT)
    assert bool(jnp.all(jnp.isfinite(out)))
    # bf16 weights vs f32 reference -> loosen tolerance accordingly.
    assert bool(jnp.allclose(out, ref, atol=3e-2, rtol=3e-2))

    print("KERNEL_OK")
</pallas_src>

<mosaic_0001>
module attributes {stable_mosaic.version = 11 : i64} {
  func.func @_fused_kernel(%arg0: i32, %arg1: memref<8x768xf32, #tpu.memory_space<vmem>>, %arg2: memref<15x8x8xf32, #tpu.memory_space<vmem>>, %arg3: memref<8x384xf32, #tpu.memory_space<vmem>>, %arg4: memref<8x32xf32, #tpu.memory_space<vmem>>, %arg5: memref<1x32xf32, #tpu.memory_space<vmem>>, %arg6: memref<768x512xbf16, #tpu.memory_space<vmem>>, %arg7: memref<32x512xbf16, #tpu.memory_space<vmem>>, %arg8: memref<384x512xbf16, #tpu.memory_space<vmem>>, %arg9: memref<1x512xf32, #tpu.memory_space<vmem>>, %arg10: memref<512x512xbf16, #tpu.memory_space<vmem>>, %arg11: memref<1x512xf32, #tpu.memory_space<vmem>>, %arg12: memref<8x512xf32, #tpu.memory_space<vmem>>) attributes {dimension_semantics = [#tpu.dimension_semantics<parallel>], iteration_bounds = array<i64: 1>, scalar_prefetch = 0 : i64, scratch_operands = 0 : i64, tpu.core_type = #tpu.core_type<tc>, window_params = [{transform_indices = @transform_0, window_bounds = array<i64: 8, 768>}, {transform_indices = @transform_1, window_bounds = array<i64: 15, 8, 8>}, {transform_indices = @transform_2, window_bounds = array<i64: 8, 384>}, {pipeline_mode = #tpu.pipeline_mode<synchronous>, transform_indices = @transform_3, window_bounds = array<i64: 8, 32>}, {pipeline_mode = #tpu.pipeline_mode<synchronous>, transform_indices = @transform_4, window_bounds = array<i64: 1, 32>}, {pipeline_mode = #tpu.pipeline_mode<synchronous>, transform_indices = @transform_5, window_bounds = array<i64: 768, 512>}, {pipeline_mode = #tpu.pipeline_mode<synchronous>, transform_indices = @transform_6, window_bounds = array<i64: 32, 512>}, {pipeline_mode = #tpu.pipeline_mode<synchronous>, transform_indices = @transform_7, window_bounds = array<i64: 384, 512>}, {pipeline_mode = #tpu.pipeline_mode<synchronous>, transform_indices = @transform_8, window_bounds = array<i64: 1, 512>}, {pipeline_mode = #tpu.pipeline_mode<synchronous>, transform_indices = @transform_9, window_bounds = array<i64: 512, 512>}, {pipeline_mode = #tpu.pipeline_mode<synchronous>, transform_indices = @transform_10, window_bounds = array<i64: 1, 512>}, {transform_indices = @transform_11, window_bounds = array<i64: 8, 512>}]} {
    %c0 = arith.constant 0 : index
    %c0_0 = arith.constant 0 : index
    %0 = vector.load %arg4[%c0, %c0_0] : memref<8x32xf32, #tpu.memory_space<vmem>>, vector<8x32xf32>
    %c0_1 = arith.constant 0 : index
    %c0_2 = arith.constant 0 : index
    %1 = vector.load %arg5[%c0_1, %c0_2] : memref<1x32xf32, #tpu.memory_space<vmem>>, vector<1x32xf32>
    %cst = arith.constant 0.000000e+00 : f32
    %2 = vector.broadcast %cst : f32 to vector<8x32xf32>
    %c0_3 = arith.constant 0 : index
    %c0_4 = arith.constant 0 : index
    %c0_5 = arith.constant 0 : index
    %3 = vector.load %arg2[%c0_3, %c0_4, %c0_5] : memref<15x8x8xf32, #tpu.memory_space<vmem>>, vector<1x8x8xf32>
    %4 = vector.shape_cast %3 : vector<1x8x8xf32> to vector<8x8xf32>
    %cst_6 = arith.constant dense<0.000000e+00> : vector<8x32xf32>
    %5 = tpu.matmul %4, %0, %cst_6 {dimension_numbers = #tpu.dot_dimension_numbers<[1], [0], [0], [1], [0, 0, 1, 1], [], []>} : vector<8x8xf32>, vector<8x32xf32>, vector<8x32xf32> -> vector<8x32xf32>
    %6 = vector.broadcast %1 : vector<1x32xf32> to vector<8x32xf32>
    %7 = arith.addf %5, %6 : vector<8x32xf32>
    %cst_7 = arith.constant 0.000000e+00 : f32
    %8 = vector.broadcast %cst_7 : f32 to vector<8x32xf32>
    %9 = arith.maximumf %7, %8 : vector<8x32xf32>
    %10 = arith.addf %2, %9 : vector<8x32xf32>
    %c1 = arith.constant 1 : index
    %c0_8 = arith.constant 0 : index
    %c0_9 = arith.constant 0 : index
    %11 = vector.load %arg2[%c1, %c0_8, %c0_9] : memref<15x8x8xf32, #tpu.memory_space<vmem>>, vector<1x8x8xf32>
    %12 = vector.shape_cast %11 : vector<1x8x8xf32> to vector<8x8xf32>
    %cst_10 = arith.constant dense<0.000000e+00> : vector<8x32xf32>
    %13 = tpu.matmul %12, %0, %cst_10 {dimension_numbers = #tpu.dot_dimension_numbers<[1], [0], [0], [1], [0, 0, 1, 1], [], []>} : vector<8x8xf32>, vector<8x32xf32>, vector<8x32xf32> -> vector<8x32xf32>
    %14 = vector.broadcast %1 : vector<1x32xf32> to vector<8x32xf32>
    %15 = arith.addf %13, %14 : vector<8x32xf32>
    %cst_11 = arith.constant 0.000000e+00 : f32
    %16 = vector.broadcast %cst_11 : f32 to vector<8x32xf32>
    %17 = arith.maximumf %15, %16 : vector<8x32xf32>
    %18 = arith.addf %10, %17 : vector<8x32xf32>
    %c2 = arith.constant 2 : index
    %c0_12 = arith.constant 0 : index
    %c0_13 = arith.constant 0 : index
    %19 = vector.load %arg2[%c2, %c0_12, %c0_13] : memref<15x8x8xf32, #tpu.memory_space<vmem>>, vector<1x8x8xf32>
    %20 = vector.shape_cast %19 : vector<1x8x8xf32> to vector<8x8xf32>
    %cst_14 = arith.constant dense<0.000000e+00> : vector<8x32xf32>
    %21 = tpu.matmul %20, %0, %cst_14 {dimension_numbers = #tpu.dot_dimension_numbers<[1], [0], [0], [1], [0, 0, 1, 1], [], []>} : vector<8x8xf32>, vector<8x32xf32>, vector<8x32xf32> -> vector<8x32xf32>
    %22 = vector.broadcast %1 : vector<1x32xf32> to vector<8x32xf32>
    %23 = arith.addf %21, %22 : vector<8x32xf32>
    %cst_15 = arith.constant 0.000000e+00 : f32
    %24 = vector.broadcast %cst_15 : f32 to vector<8x32xf32>
    %25 = arith.maximumf %23, %24 : vector<8x32xf32>
    %26 = arith.addf %18, %25 : vector<8x32xf32>
    %c3 = arith.constant 3 : index
    %c0_16 = arith.constant 0 : index
    %c0_17 = arith.constant 0 : index
    %27 = vector.load %arg2[%c3, %c0_16, %c0_17] : memref<15x8x8xf32, #tpu.memory_space<vmem>>, vector<1x8x8xf32>
    %28 = vector.shape_cast %27 : vector<1x8x8xf32> to vector<8x8xf32>
    %cst_18 = arith.constant dense<0.000000e+00> : vector<8x32xf32>
    %29 = tpu.matmul %28, %0, %cst_18 {dimension_numbers = #tpu.dot_dimension_numbers<[1], [0], [0], [1], [0, 0, 1, 1], [], []>} : vector<8x8xf32>, vector<8x32xf32>, vector<8x32xf32> -> vector<8x32xf32>
    %30 = vector.broadcast %1 : vector<1x32xf32> to vector<8x32xf32>
    %31 = arith.addf %29, %30 : vector<8x32xf32>
    %cst_19 = arith.constant 0.000000e+00 : f32
    %32 = vector.broadcast %cst_19 : f32 to vector<8x32xf32>
    %33 = arith.maximumf %31, %32 : vector<8x32xf32>
    %34 = arith.addf %26, %33 : vector<8x32xf32>
    %c4 = arith.constant 4 : index
    %c0_20 = arith.constant 0 : index
    %c0_21 = arith.constant 0 : index
    %35 = vector.load %arg2[%c4, %c0_20, %c0_21] : memref<15x8x8xf32, #tpu.memory_space<vmem>>, vector<1x8x8xf32>
    %36 = vector.shape_cast %35 : vector<1x8x8xf32> to vector<8x8xf32>
    %cst_22 = arith.constant dense<0.000000e+00> : vector<8x32xf32>
    %37 = tpu.matmul %36, %0, %cst_22 {dimension_numbers = #tpu.dot_dimension_numbers<[1], [0], [0], [1], [0, 0, 1, 1], [], []>} : vector<8x8xf32>, vector<8x32xf32>, vector<8x32xf32> -> vector<8x32xf32>
    %38 = vector.broadcast %1 : vector<1x32xf32> to vector<8x32xf32>
    %39 = arith.addf %37, %38 : vector<8x32xf32>
    %cst_23 = arith.constant 0.000000e+00 : f32
    %40 = vector.broadcast %cst_23 : f32 to vector<8x32xf32>
    %41 = arith.maximumf %39, %40 : vector<8x32xf32>
    %42 = arith.addf %34, %41 : vector<8x32xf32>
    %c5 = arith.constant 5 : index
    %c0_24 = arith.constant 0 : index
    %c0_25 = arith.constant 0 : index
    %43 = vector.load %arg2[%c5, %c0_24, %c0_25] : memref<15x8x8xf32, #tpu.memory_space<vmem>>, vector<1x8x8xf32>
    %44 = vector.shape_cast %43 : vector<1x8x8xf32> to vector<8x8xf32>
    %cst_26 = arith.constant dense<0.000000e+00> : vector<8x32xf32>
    %45 = tpu.matmul %44, %0, %cst_26 {dimension_numbers = #tpu.dot_dimension_numbers<[1], [0], [0], [1], [0, 0, 1, 1], [], []>} : vector<8x8xf32>, vector<8x32xf32>, vector<8x32xf32> -> vector<8x32xf32>
    %46 = vector.broadcast %1 : vector<1x32xf32> to vector<8x32xf32>
    %47 = arith.addf %45, %46 : vector<8x32xf32>
    %cst_27 = arith.constant 0.000000e+00 : f32
    %48 = vector.broadcast %cst_27 : f32 to vector<8x32xf32>
    %49 = arith.maximumf %47, %48 : vector<8x32xf32>
    %50 = arith.addf %42, %49 : vector<8x32xf32>
    %c6 = arith.constant 6 : index
    %c0_28 = arith.constant 0 : index
    %c0_29 = arith.constant 0 : index
    %51 = vector.load %arg2[%c6, %c0_28, %c0_29] : memref<15x8x8xf32, #tpu.memory_space<vmem>>, vector<1x8x8xf32>
    %52 = vector.shape_cast %51 : vector<1x8x8xf32> to vector<8x8xf32>
    %cst_30 = arith.constant dense<0.000000e+00> : vector<8x32xf32>
    %53 = tpu.matmul %52, %0, %cst_30 {dimension_numbers = #tpu.dot_dimension_numbers<[1], [0], [0], [1], [0, 0, 1, 1], [], []>} : vector<8x8xf32>, vector<8x32xf32>, vector<8x32xf32> -> vector<8x32xf32>
    %54 = vector.broadcast %1 : vector<1x32xf32> to vector<8x32xf32>
    %55 = arith.addf %53, %54 : vector<8x32xf32>
    %cst_31 = arith.constant 0.000000e+00 : f32
    %56 = vector.broadcast %cst_31 : f32 to vector<8x32xf32>
    %57 = arith.maximumf %55, %56 : vector<8x32xf32>
    %58 = arith.addf %50, %57 : vector<8x32xf32>
    %c7 = arith.constant 7 : index
    %c0_32 = arith.constant 0 : index
    %c0_33 = arith.constant 0 : index
    %59 = vector.load %arg2[%c7, %c0_32, %c0_33] : memref<15x8x8xf32, #tpu.memory_space<vmem>>, vector<1x8x8xf32>
    %60 = vector.shape_cast %59 : vector<1x8x8xf32> to vector<8x8xf32>
    %cst_34 = arith.constant dense<0.000000e+00> : vector<8x32xf32>
    %61 = tpu.matmul %60, %0, %cst_34 {dimension_numbers = #tpu.dot_dimension_numbers<[1], [0], [0], [1], [0, 0, 1, 1], [], []>} : vector<8x8xf32>, vector<8x32xf32>, vector<8x32xf32> -> vector<8x32xf32>
    %62 = vector.broadcast %1 : vector<1x32xf32> to vector<8x32xf32>
    %63 = arith.addf %61, %62 : vector<8x32xf32>
    %cst_35 = arith.constant 0.000000e+00 : f32
    %64 = vector.broadcast %cst_35 : f32 to vector<8x32xf32>
    %65 = arith.maximumf %63, %64 : vector<8x32xf32>
    %66 = arith.addf %58, %65 : vector<8x32xf32>
    %c8 = arith.constant 8 : index
    %c0_36 = arith.constant 0 : index
    %c0_37 = arith.constant 0 : index
    %67 = vector.load %arg2[%c8, %c0_36, %c0_37] : memref<15x8x8xf32, #tpu.memory_space<vmem>>, vector<1x8x8xf32>
    %68 = vector.shape_cast %67 : vector<1x8x8xf32> to vector<8x8xf32>
    %cst_38 = arith.constant dense<0.000000e+00> : vector<8x32xf32>
    %69 = tpu.matmul %68, %0, %cst_38 {dimension_numbers = #tpu.dot_dimension_numbers<[1], [0], [0], [1], [0, 0, 1, 1], [], []>} : vector<8x8xf32>, vector<8x32xf32>, vector<8x32xf32> -> vector<8x32xf32>
    %70 = vector.broadcast %1 : vector<1x32xf32> to vector<8x32xf32>
    %71 = arith.addf %69, %70 : vector<8x32xf32>
    %cst_39 = arith.constant 0.000000e+00 : f32
    %72 = vector.broadcast %cst_39 : f32 to vector<8x32xf32>
    %73 = arith.maximumf %71, %72 : vector<8x32xf32>
    %74 = arith.addf %66, %73 : vector<8x32xf32>
    %c9 = arith.constant 9 : index
    %c0_40 = arith.constant 0 : index
    %c0_41 = arith.constant 0 : index
    %75 = vector.load %arg2[%c9, %c0_40, %c0_41] : memref<15x8x8xf32, #tpu.memory_space<vmem>>, vector<1x8x8xf32>
    %76 = vector.shape_cast %75 : vector<1x8x8xf32> to vector<8x8xf32>
    %cst_42 = arith.constant dense<0.000000e+00> : vector<8x32xf32>
    %77 = tpu.matmul %76, %0, %cst_42 {dimension_numbers = #tpu.dot_dimension_numbers<[1], [0], [0], [1], [0, 0, 1, 1], [], []>} : vector<8x8xf32>, vector<8x32xf32>, vector<8x32xf32> -> vector<8x32xf32>
    %78 = vector.broadcast %1 : vector<1x32xf32> to vector<8x32xf32>
    %79 = arith.addf %77, %78 : vector<8x32xf32>
    %cst_43 = arith.constant 0.000000e+00 : f32
    %80 = vector.broadcast %cst_43 : f32 to vector<8x32xf32>
    %81 = arith.maximumf %79, %80 : vector<8x32xf32>
    %82 = arith.addf %74, %81 : vector<8x32xf32>
    %c10 = arith.constant 10 : index
    %c0_44 = arith.constant 0 : index
    %c0_45 = arith.constant 0 : index
    %83 = vector.load %arg2[%c10, %c0_44, %c0_45] : memref<15x8x8xf32, #tpu.memory_space<vmem>>, vector<1x8x8xf32>
    %84 = vector.shape_cast %83 : vector<1x8x8xf32> to vector<8x8xf32>
    %cst_46 = arith.constant dense<0.000000e+00> : vector<8x32xf32>
    %85 = tpu.matmul %84, %0, %cst_46 {dimension_numbers = #tpu.dot_dimension_numbers<[1], [0], [0], [1], [0, 0, 1, 1], [], []>} : vector<8x8xf32>, vector<8x32xf32>, vector<8x32xf32> -> vector<8x32xf32>
    %86 = vector.broadcast %1 : vector<1x32xf32> to vector<8x32xf32>
    %87 = arith.addf %85, %86 : vector<8x32xf32>
    %cst_47 = arith.constant 0.000000e+00 : f32
    %88 = vector.broadcast %cst_47 : f32 to vector<8x32xf32>
    %89 = arith.maximumf %87, %88 : vector<8x32xf32>
    %90 = arith.addf %82, %89 : vector<8x32xf32>
    %c11 = arith.constant 11 : index
    %c0_48 = arith.constant 0 : index
    %c0_49 = arith.constant 0 : index
    %91 = vector.load %arg2[%c11, %c0_48, %c0_49] : memref<15x8x8xf32, #tpu.memory_space<vmem>>, vector<1x8x8xf32>
    %92 = vector.shape_cast %91 : vector<1x8x8xf32> to vector<8x8xf32>
    %cst_50 = arith.constant dense<0.000000e+00> : vector<8x32xf32>
    %93 = tpu.matmul %92, %0, %cst_50 {dimension_numbers = #tpu.dot_dimension_numbers<[1], [0], [0], [1], [0, 0, 1, 1], [], []>} : vector<8x8xf32>, vector<8x32xf32>, vector<8x32xf32> -> vector<8x32xf32>
    %94 = vector.broadcast %1 : vector<1x32xf32> to vector<8x32xf32>
    %95 = arith.addf %93, %94 : vector<8x32xf32>
    %cst_51 = arith.constant 0.000000e+00 : f32
    %96 = vector.broadcast %cst_51 : f32 to vector<8x32xf32>
    %97 = arith.maximumf %95, %96 : vector<8x32xf32>
    %98 = arith.addf %90, %97 : vector<8x32xf32>
    %c12 = arith.constant 12 : index
    %c0_52 = arith.constant 0 : index
    %c0_53 = arith.constant 0 : index
    %99 = vector.load %arg2[%c12, %c0_52, %c0_53] : memref<15x8x8xf32, #tpu.memory_space<vmem>>, vector<1x8x8xf32>
    %100 = vector.shape_cast %99 : vector<1x8x8xf32> to vector<8x8xf32>
    %cst_54 = arith.constant dense<0.000000e+00> : vector<8x32xf32>
    %101 = tpu.matmul %100, %0, %cst_54 {dimension_numbers = #tpu.dot_dimension_numbers<[1], [0], [0], [1], [0, 0, 1, 1], [], []>} : vector<8x8xf32>, vector<8x32xf32>, vector<8x32xf32> -> vector<8x32xf32>
    %102 = vector.broadcast %1 : vector<1x32xf32> to vector<8x32xf32>
    %103 = arith.addf %101, %102 : vector<8x32xf32>
    %cst_55 = arith.constant 0.000000e+00 : f32
    %104 = vector.broadcast %cst_55 : f32 to vector<8x32xf32>
    %105 = arith.maximumf %103, %104 : vector<8x32xf32>
    %106 = arith.addf %98, %105 : vector<8x32xf32>
    %c13 = arith.constant 13 : index
    %c0_56 = arith.constant 0 : index
    %c0_57 = arith.constant 0 : index
    %107 = vector.load %arg2[%c13, %c0_56, %c0_57] : memref<15x8x8xf32, #tpu.memory_space<vmem>>, vector<1x8x8xf32>
    %108 = vector.shape_cast %107 : vector<1x8x8xf32> to vector<8x8xf32>
    %cst_58 = arith.constant dense<0.000000e+00> : vector<8x32xf32>
    %109 = tpu.matmul %108, %0, %cst_58 {dimension_numbers = #tpu.dot_dimension_numbers<[1], [0], [0], [1], [0, 0, 1, 1], [], []>} : vector<8x8xf32>, vector<8x32xf32>, vector<8x32xf32> -> vector<8x32xf32>
    %110 = vector.broadcast %1 : vector<1x32xf32> to vector<8x32xf32>
    %111 = arith.addf %109, %110 : vector<8x32xf32>
    %cst_59 = arith.constant 0.000000e+00 : f32
    %112 = vector.broadcast %cst_59 : f32 to vector<8x32xf32>
    %113 = arith.maximumf %111, %112 : vector<8x32xf32>
    %114 = arith.addf %106, %113 : vector<8x32xf32>
    %c14 = arith.constant 14 : index
    %c0_60 = arith.constant 0 : index
    %c0_61 = arith.constant 0 : index
    %115 = vector.load %arg2[%c14, %c0_60, %c0_61] : memref<15x8x8xf32, #tpu.memory_space<vmem>>, vector<1x8x8xf32>
    %116 = vector.shape_cast %115 : vector<1x8x8xf32> to vector<8x8xf32>
    %cst_62 = arith.constant dense<0.000000e+00> : vector<8x32xf32>
    %117 = tpu.matmul %116, %0, %cst_62 {dimension_numbers = #tpu.dot_dimension_numbers<[1], [0], [0], [1], [0, 0, 1, 1], [], []>} : vector<8x8xf32>, vector<8x32xf32>, vector<8x32xf32> -> vector<8x32xf32>
    %118 = vector.broadcast %1 : vector<1x32xf32> to vector<8x32xf32>
    %119 = arith.addf %117, %118 : vector<8x32xf32>
    %cst_63 = arith.constant 0.000000e+00 : f32
    %120 = vector.broadcast %cst_63 : f32 to vector<8x32xf32>
    %121 = arith.maximumf %119, %120 : vector<8x32xf32>
    %122 = arith.addf %114, %121 : vector<8x32xf32>
    %cst_64 = arith.constant 0.0666666701 : f32
    %123 = vector.broadcast %cst_64 : f32 to vector<8x32xf32>
    %124 = arith.mulf %122, %123 : vector<8x32xf32>
    %c0_65 = arith.constant 0 : index
    %c0_66 = arith.constant 0 : index
    %125 = vector.load %arg1[%c0_65, %c0_66] : memref<8x768xf32, #tpu.memory_space<vmem>>, vector<8x768xf32>
    %126 = arith.truncf %125 : vector<8x768xf32> to vector<8x768xbf16>
    %c0_67 = arith.constant 0 : index
    %c0_68 = arith.constant 0 : index
    %127 = vector.load %arg6[%c0_67, %c0_68] : memref<768x512xbf16, #tpu.memory_space<vmem>>, vector<768x512xbf16>
    %cst_69 = arith.constant dense<0.000000e+00> : vector<8x512xf32>
    %128 = tpu.matmul %126, %127, %cst_69 {dimension_numbers = #tpu.dot_dimension_numbers<[1], [0], [0], [1], [0, 0, 1, 1], [], []>} : vector<8x768xbf16>, vector<768x512xbf16>, vector<8x512xf32> -> vector<8x512xf32>
    %129 = arith.truncf %124 : vector<8x32xf32> to vector<8x32xbf16>
    %c0_70 = arith.constant 0 : index
    %c0_71 = arith.constant 0 : index
    %130 = vector.load %arg7[%c0_70, %c0_71] : memref<32x512xbf16, #tpu.memory_space<vmem>>, vector<32x512xbf16>
    %cst_72 = arith.constant dense<0.000000e+00> : vector<8x512xf32>
    %131 = tpu.matmul %129, %130, %cst_72 {dimension_numbers = #tpu.dot_dimension_numbers<[1], [0], [0], [1], [0, 0, 1, 1], [], []>} : vector<8x32xbf16>, vector<32x512xbf16>, vector<8x512xf32> -> vector<8x512xf32>
    %132 = arith.addf %128, %131 : vector<8x512xf32>
    %c0_73 = arith.constant 0 : index
    %c0_74 = arith.constant 0 : index
    %133 = vector.load %arg3[%c0_73, %c0_74] : memref<8x384xf32, #tpu.memory_space<vmem>>, vector<8x384xf32>
    %134 = arith.truncf %133 : vector<8x384xf32> to vector<8x384xbf16>
    %c0_75 = arith.constant 0 : index
    %c0_76 = arith.constant 0 : index
    %135 = vector.load %arg8[%c0_75, %c0_76] : memref<384x512xbf16, #tpu.memory_space<vmem>>, vector<384x512xbf16>
    %cst_77 = arith.constant dense<0.000000e+00> : vector<8x512xf32>
    %136 = tpu.matmul %134, %135, %cst_77 {dimension_numbers = #tpu.dot_dimension_numbers<[1], [0], [0], [1], [0, 0, 1, 1], [], []>} : vector<8x384xbf16>, vector<384x512xbf16>, vector<8x512xf32> -> vector<8x512xf32>
    %137 = arith.addf %132, %136 : vector<8x512xf32>
    %c0_78 = arith.constant 0 : index
    %c0_79 = arith.constant 0 : index
    %138 = vector.load %arg9[%c0_78, %c0_79] : memref<1x512xf32, #tpu.memory_space<vmem>>, vector<1x512xf32>
    %139 = vector.broadcast %138 : vector<1x512xf32> to vector<8x512xf32>
    %140 = arith.addf %137, %139 : vector<8x512xf32>
    %cst_80 = arith.constant 0.000000e+00 : f32
    %141 = vector.broadcast %cst_80 : f32 to vector<8x512xf32>
    %142 = arith.maximumf %140, %141 : vector<8x512xf32>
    %143 = arith.truncf %142 : vector<8x512xf32> to vector<8x512xbf16>
    %c0_81 = arith.constant 0 : index
    %c0_82 = arith.constant 0 : index
    %144 = vector.load %arg10[%c0_81, %c0_82] : memref<512x512xbf16, #tpu.memory_space<vmem>>, vector<512x512xbf16>
    %cst_83 = arith.constant dense<0.000000e+00> : vector<8x512xf32>
    %145 = tpu.matmul %143, %144, %cst_83 {dimension_numbers = #tpu.dot_dimension_numbers<[1], [0], [0], [1], [0, 0, 1, 1], [], []>} : vector<8x512xbf16>, vector<512x512xbf16>, vector<8x512xf32> -> vector<8x512xf32>
    %c0_84 = arith.constant 0 : index
    %c0_85 = arith.constant 0 : index
    %146 = vector.load %arg11[%c0_84, %c0_85] : memref<1x512xf32, #tpu.memory_space<vmem>>, vector<1x512xf32>
    %147 = vector.broadcast %146 : vector<1x512xf32> to vector<8x512xf32>
    %148 = arith.addf %145, %147 : vector<8x512xf32>
    %c0_86 = arith.constant 0 : index
    %c0_87 = arith.constant 0 : index
    %149 = vector.load %arg12[%c0_86, %c0_87] : memref<8x512xf32, #tpu.memory_space<vmem>>, vector<8x512xf32>
    tpu.vector_store %arg12[%c0_86, %c0_87], %148 {strides = array<i32>} : memref<8x512xf32, #tpu.memory_space<vmem>>, vector<8x512xf32>,
    return
  }
  func.func @transform_0(%arg0: i32) -> (i32, i32) {
    %c0_i32 = arith.constant 0 : i32
    %c0_i32_0 = arith.constant 0 : i32
    return %arg0, %c0_i32 : i32, i32
  }
  func.func @transform_1(%arg0: i32) -> (i32, i32, i32) {
    %c0_i32 = arith.constant 0 : i32
    %c0_i32_0 = arith.constant 0 : i32
    %c0_i32_1 = arith.constant 0 : i32
    return %c0_i32, %arg0, %c0_i32_0 : i32, i32, i32
  }
  func.func @transform_2(%arg0: i32) -> (i32, i32) {
    %c0_i32 = arith.constant 0 : i32
    %c0_i32_0 = arith.constant 0 : i32
    return %arg0, %c0_i32 : i32, i32
  }
  func.func @transform_3(%arg0: i32) -> (i32, i32) {
    %c0_i32 = arith.constant 0 : i32
    %c0_i32_0 = arith.constant 0 : i32
    %c0_i32_1 = arith.constant 0 : i32
    return %c0_i32, %c0_i32_0 : i32, i32
  }
  func.func @transform_4(%arg0: i32) -> (i32, i32) {
    %c0_i32 = arith.constant 0 : i32
    %c0_i32_0 = arith.constant 0 : i32
    %c0_i32_1 = arith.constant 0 : i32
    return %c0_i32, %c0_i32_0 : i32, i32
  }
  func.func @transform_5(%arg0: i32) -> (i32, i32) {
    %c0_i32 = arith.constant 0 : i32
    %c0_i32_0 = arith.constant 0 : i32
    %c0_i32_1 = arith.constant 0 : i32
    return %c0_i32, %c0_i32_0 : i32, i32
  }
  func.func @transform_6(%arg0: i32) -> (i32, i32) {
    %c0_i32 = arith.constant 0 : i32
    %c0_i32_0 = arith.constant 0 : i32
    %c0_i32_1 = arith.constant 0 : i32
    return %c0_i32, %c0_i32_0 : i32, i32
  }
  func.func @transform_7(%arg0: i32) -> (i32, i32) {
    %c0_i32 = arith.constant 0 : i32
    %c0_i32_0 = arith.constant 0 : i32
    %c0_i32_1 = arith.constant 0 : i32
    return %c0_i32, %c0_i32_0 : i32, i32
  }
  func.func @transform_8(%arg0: i32) -> (i32, i32) {
    %c0_i32 = arith.constant 0 : i32
    %c0_i32_0 = arith.constant 0 : i32
    %c0_i32_1 = arith.constant 0 : i32
    return %c0_i32, %c0_i32_0 : i32, i32
  }
  func.func @transform_9(%arg0: i32) -> (i32, i32) {
    %c0_i32 = arith.constant 0 : i32
    %c0_i32_0 = arith.constant 0 : i32
    %c0_i32_1 = arith.constant 0 : i32
    return %c0_i32, %c0_i32_0 : i32, i32
  }
  func.func @transform_10(%arg0: i32) -> (i32, i32) {
    %c0_i32 = arith.constant 0 : i32
    %c0_i32_0 = arith.constant 0 : i32
    %c0_i32_1 = arith.constant 0 : i32
    return %c0_i32, %c0_i32_0 : i32, i32
  }
  func.func @transform_11(%arg0: i32) -> (i32, i32) {
    %c0_i32 = arith.constant 0 : i32
    %c0_i32_0 = arith.constant 0 : i32
    return %arg0, %c0_i32 : i32, i32
  }
}

</mosaic_0001>

<bundles_post_ra>
// kernel: tpu_custom_call.1
= control target key start
LH: loop header
LB: loop body
LE: loop exit
PB: predicated region body
PF: predicated region fallthrough
CT: control target
= control target key end

     0   :  { %16 = vsyncpa [#allocation3], 0  ;;  %s6290_s0 = inlined_call_operand.vmem [shape: f32[8,768], index: 0, kind: input, shape index: {}]   ;;  %s6291_s1 = inlined_call_operand.vmem [shape: f32[15,8,8], index: 1, kind: input, shape index: {}]   ;;  %s6292_s2 = inlined_call_operand.vmem [shape: f32[8,384], index: 2, kind: input, shape index: {}]   ;;  %s6293_s3 = inlined_call_operand.vmem [shape: f32[8,32], index: 3, kind: input, shape index: {}]   ;;  %s6294_s4 = inlined_call_operand.vmem [shape: f32[1,32], index: 4, kind: input, shape index: {}]   ;;  %s6295_s5 = inlined_call_operand.hbm [shape: bf16[768,512], index: 5, kind: input, shape index: {}]   ;;  %s6296_s6 = inlined_call_operand.vmem [shape: bf16[32,512], index: 6, kind: input, shape index: {}]   ;;  %s6297_s7 = inlined_call_operand.hbm [shape: bf16[384,512], index: 7, kind: input, shape index: {}]   ;;  %s6298_s8 = inlined_call_operand.vmem [shape: f32[1,512], index: 8, kind: input, shape index: {}]   ;;  %s6299_s9 = inlined_call_operand.hbm [shape: bf16[512,512], index: 9, kind: input, shape index: {}]   ;;  %s6300_s10 = inlined_call_operand.vmem [shape: f32[1,512], index: 10, kind: input, shape index: {}]   ;;  %s6301_s11 = inlined_call_operand.hbm [shape: f32[8,512], index: 11, kind: output, shape index: {}]  }
   0x1   :  { %17 = vsyncpa [#allocation6], 0 }
   0x2   :  { %18 = vsyncpa [#allocation4], 0  ;;  %s5860_s17 = smov [#allocation5]   ;;  %s5861_s19 = smov [#allocation2]  }
   0x3   :  { %s48_s18 = sshll.u32 %s5860_s17, 4  ;;  %s34_s20 = sshll.u32 %s5861_s19, 4  ;;  %s49_s18 = int_to_ptr.vmem [resolvable:$true] %s48_s18  ;;  %s5929_s20 = int_to_ptr.vmem [resolvable:$true] %s34_s20 }
   0x4   :  { %s5766_s23 = scalar_lea.hbm %s6297_s7, 12288 }
   0x5   :  { %p5767_p0 = scmp.ne.s32.totalorder %s6297_s7, %s5766_s23  ;;  %p5770_p1 = scmp.lt.u32.totalorder %s5766_s23, %s6297_s7 }
   0x7   :  { %p5772_p2 = pnand %p5770_p1, %p5767_p0 }
   0x9   :  { %5775 = shalt.err (!%p5772_p2)
}
   0xa   :  { %s5776_s28 = scalar_lea.vmem %s49_s18, 12288  ;;  %p5781_p4 = scmp.lt.s32.totalorder %s49_s18, %s49_s18 }
   0xb   :  { %p5777_p3 = scmp.ne.s32.totalorder %s49_s18, %s5776_s28  ;;  %p5782_p5 = scmp.lt.s32.totalorder %s5776_s28, %s5776_s28 }
   0xd   :  { %p5783_p6 = por %p5782_p5, %p5781_p4 }
   0xf   :  { %p5784_p7 = pnand %p5783_p6, %p5777_p3 }
  0x11   :  { %5787 = shalt.err (!%p5784_p7)
}
  0x12   :  { %s5862_s29 = smov 256   ;;  %s5863_s30 = smov 16  }
  0x13   :  { %54 = dma.hbm_to_vmem [thread:$0]  %s6297_s7, 12288, %s49_s18, [#allocation6], %s5862_s29, %s5862_s29, %s5863_s30  }
  0x14   :  { %s5788_s16 = scalar_lea.hbm %s6295_s5, 24576 }
  0x15   :  { %p5789_p8 = scmp.ne.s32.totalorder %s6295_s5, %s5788_s16  ;;  %p5792_p9 = scmp.lt.u32.totalorder %s5788_s16, %s6295_s5 }
  0x17   :  { %p5794_p10 = pnand %p5792_p9, %p5789_p8 }
  0x19   :  { %5797 = shalt.err (!%p5794_p10)
}
  0x1a   :  { %s5798_s23 = scalar_lea.vmem %s5929_s20, 24576  ;;  %p5803_p12 = scmp.lt.s32.totalorder %s5929_s20, %s5929_s20 }
  0x1b   :  { %p5799_p11 = scmp.ne.s32.totalorder %s5929_s20, %s5798_s23  ;;  %p5804_p13 = scmp.lt.s32.totalorder %s5798_s23, %s5798_s23 }
  0x1d   :  { %p5805_p0 = por %p5804_p13, %p5803_p12 }
  0x1f   :  { %p5806_p1 = pnand %p5805_p0, %p5799_p11 }
  0x21   :  { %5809 = shalt.err (!%p5806_p1)
}
  0x22   :  { %40 = dma.hbm_to_vmem [thread:$0]  %s6295_s5, 24576, %s5929_s20, [#allocation3], %s5862_s29, %s5862_s29, %s5863_s30  }
  0x23   :  { %s5864_s24 = smov [#allocation7]   ;;  %s5810_s28 = scalar_lea.hbm %s6299_s9, 16384 }
  0x24   :  { %s62_s25 = sshll.u32 %s5864_s24, 4  ;;  %p5811_p2 = scmp.ne.s32.totalorder %s6299_s9, %s5810_s28  ;;  %s63_s25 = int_to_ptr.vmem [resolvable:$true] %s62_s25 }
  0x25   :  { %p5814_p3 = scmp.lt.u32.totalorder %s5810_s28, %s6299_s9 }
  0x27   :  { %p5816_p4 = pnand %p5814_p3, %p5811_p2 }
  0x29   :  { %5819 = shalt.err (!%p5816_p4)
}
  0x2a   :  { %s5820_s16 = scalar_lea.vmem %s63_s25, 16384  ;;  %p5825_p6 = scmp.lt.s32.totalorder %s63_s25, %s63_s25 }
  0x2b   :  { %p5821_p5 = scmp.ne.s32.totalorder %s63_s25, %s5820_s16  ;;  %p5826_p7 = scmp.lt.s32.totalorder %s5820_s16, %s5820_s16 }
  0x2d   :  { %p5827_p8 = por %p5826_p7, %p5825_p6 }
  0x2f   :  { %p5828_p9 = pnand %p5827_p8, %p5821_p5 }
  0x31   :  { %5831 = shalt.err (!%p5828_p9)
}
  0x32   :  { %68 = dma.hbm_to_vmem [thread:$0]  %s6299_s9, 16384, %s63_s25, [#allocation6], %s5862_s29, %s5862_s29, %s5863_s30  }
  0x33   :  { %5854 = dma.done.wait [#allocation3], 24576  }
  0x34   :  { %5855 = vsyncadd [#allocation3], 4294942720 }
  0x35   :  { %5856 = dma.done.wait [#allocation6], 28672  }
  0x36   :  { %5857 = vsyncadd [#allocation6], 4294938624  ;;  %v5865_v0 = vmov 0.0   ;;  %vm5866_vm0 = vmmov 0   ;;  %vm90_vm1 = vcmask 64512   ;;  %v5990_v1 = vld [vmem:[%s6293_s3] sm:$0xff] }
  0x37   :  { %5034 = vmatprep.subr.mxu0 %v5865_v0  ;;  %5036 = vmatprep.mubr.msk.f32.mxu0 %vm5866_vm0, %v5865_v0  ;;  %v83_v2 = vld [vmem:[%s6291_s1] sm:$0xff]  ;;  %v4550_v3 = vld [vmem:[%s6291_s1 + $0x8] sm:$0xff]  ;;  %v4552_v4 = vld [vmem:[%s6291_s1 + $0x10] sm:$0xff]  ;;  %v5867_v26 = vmov 0   ;;  %vm1498_vm2 = vcmask 261120   ;;  %s5868_s15 = smov [#allocation8]  }
  0x38   :  { %5039 = vmatprep.subr.mxu1 %v5865_v0  ;;  %5041 = vmatprep.mubr.msk.f32.mxu1 %vm5866_vm0, %v5865_v0  ;;  %v4554_v5 = vld [vmem:[%s6291_s1 + $0x18] sm:$0xff]  ;;  %v4556_v6 = vld [vmem:[%s6291_s1 + $0x20] sm:$0xff]  ;;  %v4558_v7 = vld [vmem:[%s6291_s1 + $0x28] sm:$0xff]  ;;  %s4538_s16 = sshll.u32 %s5868_s15, 4  ;;  %s4539_s16 = int_to_ptr.vmem [resolvable:$true] %s4538_s16 }
  0x39   :  { %5035 = vmatpush3.msra.mxu0 %v5990_v1  ;;  %5040 = vmatpush3.msra.mxu1 %v5990_v1  ;;  %v4560_v8 = vld [vmem:[%s6291_s1 + $0x30] sm:$0xff]  ;;  %v4562_v9 = vld [vmem:[%s6291_s1 + $0x38] sm:$0xff]  ;;  %v4564_v10 = vld [vmem:[%s6291_s1 + $0x40] sm:$0xff]  ;;  %p5837_p11 = scmp.lt.s32.totalorder %s4539_s16, %s4539_s16 }
  0x3a   :  { %5037 = vmatmul.mubr.msk.f32.vlgmr.msra.gmra.mrb[0].mxu0 %vm90_vm1, %v83_v2  ;;  %5044 = vmatprep.subr.mxu0 %v5865_v0  ;;  %v4566_v11 = vld [vmem:[%s6291_s1 + $0x48] sm:$0xff]  ;;  %v4568_v12 = vld [vmem:[%s6291_s1 + $0x50] sm:$0xff]  ;;  %v4570_v13 = vld [vmem:[%s6291_s1 + $0x58] sm:$0xff] }
  0x3b   :  { %5042 = vmatmul.mubr.msk.f32.vlgmr.msra.gmra.mrb[0].mxu1 %vm90_vm1, %v4550_v3  ;;  %5045 = vmatpush3.msra.mxu0 %v5990_v1  ;;  %v4572_v14 = vld [vmem:[%s6291_s1 + $0x60] sm:$0xff]  ;;  %v4574_v15 = vld [vmem:[%s6291_s1 + $0x68] sm:$0xff]  ;;  %v4576_v16 = vld [vmem:[%s6291_s1 + $0x70] sm:$0xff] }
  0x3c   :  { %5049 = vmatprep.subr.mxu1 %v5865_v0  ;;  %5046 = vmatprep.mubr.msk.f32.mxu0 %vm5866_vm0, %v5865_v0  ;;  %v5132_v17 = vld [vmem:[%s6296_s6 + $0x4] ss:$16 sps:$4 sm:$0xff]   ;;  %v5135_v18 = vld [vmem:[%s6296_s6 + $0xc] ss:$16 sps:$4 sm:$0xff]   ;;  %v5130_v19 = vld [vmem:[%s6296_s6] ss:$16 sps:$4 sm:$0xff]  }
  0x3d   :  { %5050 = vmatpush3.msra.mxu1 %v5990_v1  ;;  %5054 = vmatprep.subr.mxu0 %v5865_v0  ;;  %v5133_v20 = vld [vmem:[%s6296_s6 + $0x8] ss:$16 sps:$4 sm:$0xff]   ;;  %v5138_v21 = vld [vmem:[%s6296_s6 + $0x24] ss:$16 sps:$4 sm:$0xff]   ;;  %v5141_v22 = vld [vmem:[%s6296_s6 + $0x2c] ss:$16 sps:$4 sm:$0xff]  }
  0x3e   :  { %5047 = vmatmul.mubr.msk.f32.vlgmr.msra.gmra.mrb[2].mxu0 %vm90_vm1, %v4552_v4  ;;  %5051 = vmatprep.mubr.msk.f32.mxu1 %vm5866_vm0, %v5865_v0  ;;  %v5136_v23 = vld [vmem:[%s6296_s6 + $0x20] ss:$16 sps:$4 sm:$0xff]   ;;  %v5139_v24 = vld [vmem:[%s6296_s6 + $0x28] ss:$16 sps:$4 sm:$0xff]   ;;  %v5144_v25 = vld [vmem:[#allocation2 + $0x4] ss:$16 sps:$4 sm:$0xff]  }
  0x3f   :  { %5055 = vmatpush3.msra.mxu0 %v5990_v1  ;;  %5052 = vmatmul.mubr.msk.f32.vlgmr.msra.gmra.mrb[2].mxu1 %vm90_vm1, %v4554_v5  ;;  %v5147_v27 = vld [vmem:[#allocation2 + $0x204] ss:$16 sps:$4 sm:$0xff]   ;;  %v6135_v28 = vld [vmem:[%s6294_s4] ss:$0 sm:$0xff] }
  0x40   :  { %5059 = vmatprep.subr.mxu1 %v5865_v0  ;;  %5056 = vmatprep.mubr.msk.f32.mxu0 %vm5866_vm0, %v5865_v0 }
  0x41   :  { %5060 = vmatpush3.msra.mxu1 %v5990_v1  ;;  %5064 = vmatprep.subr.mxu0 %v5865_v0 }
  0x42   :  { %5057 = vmatmul.mubr.msk.f32.vlgmr.msra.gmra.mrb[4].mxu0 %vm90_vm1, %v4556_v6  ;;  %5061 = vmatprep.mubr.msk.f32.mxu1 %vm5866_vm0, %v5865_v0 }
  0x43   :  { %5065 = vmatpush3.msra.mxu0 %v5990_v1  ;;  %5062 = vmatmul.mubr.msk.f32.vlgmr.msra.gmra.mrb[4].mxu1 %vm90_vm1, %v4558_v7 }
  0x44   :  { %5069 = vmatprep.subr.mxu1 %v5865_v0  ;;  %5066 = vmatprep.mubr.msk.f32.mxu0 %vm5866_vm0, %v5865_v0 }
  0x45   :  { %5070 = vmatpush3.msra.mxu1 %v5990_v1  ;;  %5074 = vmatprep.subr.mxu0 %v5865_v0 }
  0x46   :  { %5067 = vmatmul.mubr.msk.f32.vlgmr.msra.gmra.mrb[6].mxu0 %vm90_vm1, %v4560_v8  ;;  %5071 = vmatprep.mubr.msk.f32.mxu1 %vm5866_vm0, %v5865_v0 }
  0x47   :  { %5075 = vmatpush3.msra.mxu0 %v5990_v1  ;;  %5072 = vmatmul.mubr.msk.f32.vlgmr.msra.gmra.mrb[6].mxu1 %vm90_vm1, %v4562_v9 }
  0x48   :  { %5079 = vmatprep.subr.mxu1 %v5865_v0  ;;  %5076 = vmatprep.mubr.msk.f32.mxu0 %vm5866_vm0, %v5865_v0 }
  0x49   :  { %5080 = vmatpush3.msra.mxu1 %v5990_v1  ;;  %5084 = vmatprep.subr.mxu0 %v5865_v0 }
  0x4a   :  { %5077 = vmatmul.mubr.msk.f32.vlgmr.msra.gmra.mrb[8].mxu0 %vm90_vm1, %v4564_v10  ;;  %5081 = vmatprep.mubr.msk.f32.mxu1 %vm5866_vm0, %v5865_v0 }
  0x4b   :  { %5085 = vmatpush3.msra.mxu0 %v5990_v1  ;;  %5082 = vmatmul.mubr.msk.f32.vlgmr.msra.gmra.mrb[8].mxu1 %vm90_vm1, %v4566_v11 }
  0x4c   :  { %5089 = vmatprep.subr.mxu1 %v5865_v0  ;;  %5086 = vmatprep.mubr.msk.f32.mxu0 %vm5866_vm0, %v5865_v0 }
  0x4d   :  { %5090 = vmatpush3.msra.mxu1 %v5990_v1  ;;  %5094 = vmatprep.subr.mxu0 %v5865_v0 }
  0x4e   :  { %5087 = vmatmul.mubr.msk.f32.vlgmr.msra.gmra.mrb[10].mxu0 %vm90_vm1, %v4568_v12  ;;  %5091 = vmatprep.mubr.msk.f32.mxu1 %vm5866_vm0, %v5865_v0 }
  0x4f   :  { %5095 = vmatpush3.msra.mxu0 %v5990_v1  ;;  %5092 = vmatmul.mubr.msk.f32.vlgmr.msra.gmra.mrb[10].mxu1 %vm90_vm1, %v4570_v13 }
  0x50   :  { %5099 = vmatprep.subr.mxu1 %v5865_v0  ;;  %5096 = vmatprep.mubr.msk.f32.mxu0 %vm5866_vm0, %v5865_v0 }
  0x51   :  { %5100 = vmatpush3.msra.mxu1 %v5990_v1  ;;  %5104 = vmatprep.subr.mxu0 %v5865_v0 }
  0x52   :  { %5097 = vmatmul.mubr.msk.f32.vlgmr.msra.gmra.mrb[12].mxu0 %vm90_vm1, %v4572_v14  ;;  %5101 = vmatprep.mubr.msk.f32.mxu1 %vm5866_vm0, %v5865_v0 }
  0x53   :  { %5105 = vmatpush3.msra.mxu0 %v5990_v1  ;;  %5102 = vmatmul.mubr.msk.f32.vlgmr.msra.gmra.mrb[12].mxu1 %vm90_vm1, %v4574_v15 }
  0x54   :  { %5106 = vmatprep.mubr.msk.f32.mxu0 %vm5866_vm0, %v5865_v0  ;;  %1502 = vmatprep.subr.bf16.mxu1 %v5132_v17 }
  0x55   :  { %1543 = vmatprep.subr.bf16.mxu0 %v5135_v18  ;;  %1503 = vmatpush1.bf16.msra.mxu1 %v5130_v19 }
  0x56   :  { %5107 = vmatmul.mubr.msk.f32.vlgmr.msra.gmra.mrb[14].mxu0 %vm90_vm1, %v4576_v16  ;;  %1504 = vmatprep.subr.bf16.mxu1 %v5138_v21 }
  0x57   :  { %1544 = vmatpush1.bf16.msra.mxu0 %v5133_v20  ;;  %1534 = vmatprep.mubr.bf16.mxu1 %v5867_v26 }
  0x58   :  { %1545 = vmatprep.subr.bf16.mxu0 %v5141_v22  ;;  %1575 = vmatprep.mubr.bf16.mxu0 %v5867_v26 }
  0x59   :  { %1505 = vmatpush1.bf16.msra.mxu1 %v5136_v23 }
  0x5a   :  { %2544 = vmatprep.subr.bf16.mxu1 %v5144_v25 }
  0x5b   :  { %1546 = vmatpush1.bf16.msra.mxu0 %v5139_v24 }
  0x5c   :  { %2585 = vmatprep.subr.bf16.mxu0 %v5147_v27 }
 0x10d   :  { %v160_v29 = vpop.f32.mrb[0].mxu0 }
 0x10e   :  { %v161_v30 = vadd.f32 %v6135_v28, %v160_v29  ;;  %v5038_v31 = vpop.f32.mrb[1].mxu0  ;;  %v237_v32 = vpop.f32.mrb[0].mxu1 }
 0x10f   :  { %v238_v33 = vadd.f32 %v6135_v28, %v237_v32  ;;  %v5043_v34 = vpop.f32.mrb[1].mxu1 }
 0x110   :  { %v164_v35 = vmax.f32 %v161_v30, 0.0 }
 0x111   :  { %v241_v36 = vmax.f32 %v238_v33, 0.0  ;;  %v314_v37 = vpop.f32.mrb[2].mxu0 }
 0x112   :  { %v315_v38 = vadd.f32 %v6135_v28, %v314_v37  ;;  %v5048_v39 = vpop.f32.mrb[3].mxu0  ;;  %v391_v40 = vpop.f32.mrb[2].mxu1 }
 0x113   :  { %v242_v41 = vadd.f32 %v241_v36, %v164_v35  ;;  %v392_v42 = vadd.f32 %v6135_v28, %v391_v40  ;;  %v5053_v43 = vpop.f32.mrb[3].mxu1 }
 0x114   :  { %v318_v44 = vmax.f32 %v315_v38, 0.0  ;;  %v1248_v43 = vld [vmem:[%s6290_s0 + $0x18] sm:$0xff] }
 0x115   :  { %v395_v45 = vmax.f32 %v392_v42, 0.0  ;;  %v468_v46 = vpop.f32.mrb[4].mxu0  ;;  %v1246_v42 = vld [vmem:[%s6290_s0 + $0x8] sm:$0xff] }
 0x116   :  { %v319_v47 = vadd.f32 %v318_v44, %v242_v41  ;;  %v469_v48 = vadd.f32 %v6135_v28, %v468_v46  ;;  %v5058_v49 = vpop.f32.mrb[5].mxu0  ;;  %v545_v50 = vpop.f32.mrb[4].mxu1  ;;  %v5142_v44 = vld [vmem:[#allocation2] ss:$16 sps:$4 sm:$0xff]  }
 0x117   :  { %v546_v51 = vadd.f32 %v6135_v28, %v545_v50  ;;  %v5063_v52 = vpop.f32.mrb[5].mxu1  ;;  %v6160_v49 = vpack.c.bf16 %v1248_v43, %v1248_v43  ;;  %v5148_v50 = vld [vmem:[#allocation2 + $0x20] ss:$16 sps:$4 sm:$0xff]   ;;  %v5237_v43 = vld [vmem:[#allocation2 + $0x3e4] ss:$16 sps:$4 sm:$0xff]  }
 0x118   :  { %v396_v53 = vadd.f32 %v395_v45, %v319_v47  ;;  %v472_v54 = vmax.f32 %v469_v48, 0.0  ;;  %v5145_v45 = vld [vmem:[#allocation2 + $0x200] ss:$16 sps:$4 sm:$0xff]   ;;  %v5150_v47 = vld [vmem:[#allocation2 + $0x24] ss:$16 sps:$4 sm:$0xff]  }
 0x119   :  { %v549_v55 = vmax.f32 %v546_v51, 0.0  ;;  %v622_v56 = vpop.f32.mrb[6].mxu0  ;;  %v5153_v48 = vld [vmem:[#allocation2 + $0x224] ss:$16 sps:$4 sm:$0xff]   ;;  %v5151_v51 = vld [vmem:[#allocation2 + $0x220] ss:$16 sps:$4 sm:$0xff]  }
 0x11a   :  { %v473_v57 = vadd.f32 %v472_v54, %v396_v53  ;;  %v623_v58 = vadd.f32 %v6135_v28, %v622_v56  ;;  %v5068_v59 = vpop.f32.mrb[7].mxu0  ;;  %v699_v60 = vpop.f32.mrb[6].mxu1  ;;  %v5156_v52 = vld [vmem:[#allocation2 + $0x44] ss:$16 sps:$4 sm:$0xff]   ;;  %v5154_v54 = vld [vmem:[#allocation2 + $0x40] ss:$16 sps:$4 sm:$0xff]  }
 0x11b   :  { %v700_v61 = vadd.f32 %v6135_v28, %v699_v60  ;;  %v5073_v62 = vpop.f32.mrb[7].mxu1  ;;  %v5159_v53 = vld [vmem:[#allocation2 + $0x244] ss:$16 sps:$4 sm:$0xff]   ;;  %v5163_v59 = vld [vmem:[#allocation2 + $0x260] ss:$16 sps:$4 sm:$0xff]  }
 0x11c   :  { %v550_v63 = vadd.f32 %v549_v55, %v473_v57  ;;  %v626_v0 = vmax.f32 %v623_v58, 0.0  ;;  %v5157_v55 = vld [vmem:[#allocation2 + $0x240] ss:$16 sps:$4 sm:$0xff]   ;;  %v5162_v56 = vld [vmem:[#allocation2 + $0x64] ss:$16 sps:$4 sm:$0xff]  }
 0x11d   :  { %v703_v1 = vmax.f32 %v700_v61, 0.0  ;;  %v776_v2 = vpop.f32.mrb[8].mxu0  ;;  %v5165_v57 = vld [vmem:[#allocation2 + $0x264] ss:$16 sps:$4 sm:$0xff]   ;;  %v5160_v58 = vld [vmem:[#allocation2 + $0x60] ss:$16 sps:$4 sm:$0xff]  }
 0x11e   :  { %v627_v3 = vadd.f32 %v626_v0, %v550_v63  ;;  %v777_v4 = vadd.f32 %v6135_v28, %v776_v2  ;;  %v5078_v5 = vpop.f32.mrb[9].mxu0  ;;  %v853_v6 = vpop.f32.mrb[8].mxu1  ;;  %v5168_v60 = vld [vmem:[#allocation2 + $0x84] ss:$16 sps:$4 sm:$0xff]   ;;  %v5166_v62 = vld [vmem:[#allocation2 + $0x80] ss:$16 sps:$4 sm:$0xff]  }
 0x11f   :  { %v854_v7 = vadd.f32 %v6135_v28, %v853_v6  ;;  %v5083_v8 = vpop.f32.mrb[9].mxu1  ;;  %v5171_v61 = vld [vmem:[#allocation2 + $0x284] ss:$16 sps:$4 sm:$0xff]   ;;  %v5169_v63 = vld [vmem:[#allocation2 + $0x280] ss:$16 sps:$4 sm:$0xff]  }
 0x120   :  { %v704_v9 = vadd.f32 %v703_v1, %v627_v3  ;;  %v780_v10 = vmax.f32 %v777_v4, 0.0  ;;  %v5174_v0 = vld [vmem:[#allocation2 + $0xa4] ss:$16 sps:$4 sm:$0xff]   ;;  %v5172_v2 = vld [vmem:[#allocation2 + $0xa0] ss:$16 sps:$4 sm:$0xff]  }
 0x121   :  { %v857_v11 = vmax.f32 %v854_v7, 0.0  ;;  %v930_v12 = vpop.f32.mrb[10].mxu0  ;;  %v5177_v1 = vld [vmem:[#allocation2 + $0x2a4] ss:$16 sps:$4 sm:$0xff]   ;;  %v5175_v3 = vld [vmem:[#allocation2 + $0x2a0] ss:$16 sps:$4 sm:$0xff]  }
 0x122   :  { %v781_v13 = vadd.f32 %v780_v10, %v704_v9  ;;  %v931_v14 = vadd.f32 %v6135_v28, %v930_v12  ;;  %v5088_v15 = vpop.f32.mrb[11].mxu0  ;;  %v1007_v16 = vpop.f32.mrb[10].mxu1  ;;  %v5180_v4 = vld [vmem:[#allocation2 + $0xc4] ss:$16 sps:$4 sm:$0xff]   ;;  %v5178_v6 = vld [vmem:[#allocation2 + $0xc0] ss:$16 sps:$4 sm:$0xff]  }
 0x123   :  { %v1008_v17 = vadd.f32 %v6135_v28, %v1007_v16  ;;  %v5093_v18 = vpop.f32.mrb[11].mxu1  ;;  %v5183_v5 = vld [vmem:[#allocation2 + $0x2c4] ss:$16 sps:$4 sm:$0xff]   ;;  %v5181_v7 = vld [vmem:[#allocation2 + $0x2c0] ss:$16 sps:$4 sm:$0xff]  }
 0x124   :  { %v858_v19 = vadd.f32 %v857_v11, %v781_v13  ;;  %v934_v20 = vmax.f32 %v931_v14, 0.0  ;;  %v5186_v8 = vld [vmem:[#allocation2 + $0xe4] ss:$16 sps:$4 sm:$0xff]   ;;  %v5184_v10 = vld [vmem:[#allocation2 + $0xe0] ss:$16 sps:$4 sm:$0xff]  }
 0x125   :  { %v1011_v21 = vmax.f32 %v1008_v17, 0.0  ;;  %v1084_v22 = vpop.f32.mrb[12].mxu0  ;;  %v5189_v9 = vld [vmem:[#allocation2 + $0x2e4] ss:$16 sps:$4 sm:$0xff]   ;;  %v5187_v11 = vld [vmem:[#allocation2 + $0x2e0] ss:$16 sps:$4 sm:$0xff]  }
 0x126   :  { %v935_v23 = vadd.f32 %v934_v20, %v858_v19  ;;  %v1085_v24 = vadd.f32 %v6135_v28, %v1084_v22  ;;  %v5098_v25 = vpop.f32.mrb[13].mxu0  ;;  %v1161_v27 = vpop.f32.mrb[12].mxu1  ;;  %v5192_v12 = vld [vmem:[#allocation2 + $0x104] ss:$16 sps:$4 sm:$0xff]   ;;  %v5190_v14 = vld [vmem:[#allocation2 + $0x100] ss:$16 sps:$4 sm:$0xff]  }
 0x127   :  { %v1162_v29 = vadd.f32 %v6135_v28, %v1161_v27  ;;  %v5103_v30 = vpop.f32.mrb[13].mxu1  ;;  %v5195_v13 = vld [vmem:[#allocation2 + $0x304] ss:$16 sps:$4 sm:$0xff]   ;;  %v5193_v15 = vld [vmem:[#allocation2 + $0x300] ss:$16 sps:$4 sm:$0xff]  }
 0x128   :  { %v1012_v31 = vadd.f32 %v1011_v21, %v935_v23  ;;  %v1088_v32 = vmax.f32 %v1085_v24, 0.0  ;;  %v5198_v16 = vld [vmem:[#allocation2 + $0x124] ss:$16 sps:$4 sm:$0xff]   ;;  %v5196_v18 = vld [vmem:[#allocation2 + $0x120] ss:$16 sps:$4 sm:$0xff]  }
 0x129   :  { %v1165_v33 = vmax.f32 %v1162_v29, 0.0  ;;  %v1238_v34 = vpop.f32.mrb[14].mxu0  ;;  %v5201_v17 = vld [vmem:[#allocation2 + $0x324] ss:$16 sps:$4 sm:$0xff]   ;;  %v5199_v19 = vld [vmem:[#allocation2 + $0x320] ss:$16 sps:$4 sm:$0xff]  }
 0x12a   :  { %v1089_v35 = vadd.f32 %v1088_v32, %v1012_v31  ;;  %v1239_v36 = vadd.f32 %v6135_v28, %v1238_v34  ;;  %v5108_v37 = vpop.f32.mrb[15].mxu0  ;;  %v6158_v28 = vpack.c.bf16 %v1246_v42, %v1246_v42  ;;  %v5204_v20 = vld [vmem:[#allocation2 + $0x144] ss:$16 sps:$4 sm:$0xff]   ;;  %v5202_v22 = vld [vmem:[#allocation2 + $0x140] ss:$16 sps:$4 sm:$0xff]  }
 0x12b   :  { %v5207_v21 = vld [vmem:[#allocation2 + $0x344] ss:$16 sps:$4 sm:$0xff]   ;;  %v5205_v23 = vld [vmem:[#allocation2 + $0x340] ss:$16 sps:$4 sm:$0xff]  }
 0x12c   :  { %v1166_v38 = vadd.f32 %v1165_v33, %v1089_v35  ;;  %v1242_v39 = vmax.f32 %v1239_v36, 0.0  ;;  %v5210_v24 = vld [vmem:[#allocation2 + $0x164] ss:$16 sps:$4 sm:$0xff]   ;;  %v5208_v27 = vld [vmem:[#allocation2 + $0x160] ss:$16 sps:$4 sm:$0xff]  }
 0x12d   :  { %v5213_v25 = vld [vmem:[#allocation2 + $0x364] ss:$16 sps:$4 sm:$0xff]   ;;  %v5211_v29 = vld [vmem:[#allocation2 + $0x360] ss:$16 sps:$4 sm:$0xff]  }
 0x12e   :  { %v1243_v40 = vadd.f32 %v1242_v39, %v1166_v38  ;;  %v5216_v30 = vld [vmem:[#allocation2 + $0x184] ss:$16 sps:$4 sm:$0xff]   ;;  %v5214_v32 = vld [vmem:[#allocation2 + $0x180] ss:$16 sps:$4 sm:$0xff]  }
 0x12f   :  { %v5219_v31 = vld [vmem:[#allocation2 + $0x384] ss:$16 sps:$4 sm:$0xff]   ;;  %v5217_v33 = vld [vmem:[#allocation2 + $0x380] ss:$16 sps:$4 sm:$0xff]  }
 0x130   :  { %v1244_v41 = vmul.f32 0.06666667, %v1243_v40  ;;  %v5222_v34 = vld [vmem:[#allocation2 + $0x1a4] ss:$16 sps:$4 sm:$0xff]   ;;  %v5220_v36 = vld [vmem:[#allocation2 + $0x1a0] ss:$16 sps:$4 sm:$0xff]  }
 0x131   :  { %v5225_v35 = vld [vmem:[#allocation2 + $0x3a4] ss:$16 sps:$4 sm:$0xff]   ;;  %v5223_v37 = vld [vmem:[#allocation2 + $0x3a0] ss:$16 sps:$4 sm:$0xff]  }
 0x132   :  { %v1449_v46 = vpack.c.bf16 %v1244_v41, %v1244_v41  ;;  %v5228_v38 = vld [vmem:[#allocation2 + $0x1c4] ss:$16 sps:$4 sm:$0xff]   ;;  %v5226_v40 = vld [vmem:[#allocation2 + $0x1c0] ss:$16 sps:$4 sm:$0xff]  }
 0x133   :  { %v5231_v39 = vld [vmem:[#allocation2 + $0x3c4] ss:$16 sps:$4 sm:$0xff]   ;;  %v5229_v41 = vld [vmem:[#allocation2 + $0x3c0] ss:$16 sps:$4 sm:$0xff]  }
 0x134   :  { %4586 = vmatmul.mubr.msk.bf16.vlgmr.msra.gmra.mrb[16].mxu1 %vm1498_vm2, %v1449_v46  ;;  %4587 = vmatmul.mubr.msk.bf16.vlgmr.msra.gmra.mrb[16].mxu0 %vm1498_vm2, %v1449_v46  ;;  %v5234_v42 = vld [vmem:[#allocation2 + $0x1e4] ss:$16 sps:$4 sm:$0xff]  }
 0x135   :  { %2545 = vmatpush1.bf16.msra.mxu1 %v5142_v44  ;;  %2586 = vmatpush1.bf16.msra.mxu0 %v5145_v45  ;;  %v5232_v44 = vld [vmem:[#allocation2 + $0x1e0] ss:$16 sps:$4 sm:$0xff]  }
 0x136   :  { %2546 = vmatprep.subr.bf16.mxu1 %v5150_v47  ;;  %2587 = vmatprep.subr.bf16.mxu0 %v5153_v48  ;;  %v5235_v45 = vld [vmem:[#allocation2 + $0x3e0] ss:$16 sps:$4 sm:$0xff]   ;;  %v5240_v48 = vld [vmem:[#allocation2 + $0x404] ss:$16 sps:$4 sm:$0xff]  }
 0x137   :  { %2576 = vmatprep.mubr.bf16.mxu1 %v6158_v28  ;;  %2617 = vmatprep.mubr.bf16.mxu0 %v6160_v49  ;;  %v1245_v46 = vld [vmem:[%s6290_s0] sm:$0xff]  ;;  %v1247_v47 = vld [vmem:[%s6290_s0 + $0x10] sm:$0xff] }
 0x139   :  { %2547 = vmatpush1.bf16.msra.mxu1 %v5148_v50  ;;  %2588 = vmatpush1.bf16.msra.mxu0 %v5151_v51  ;;  %v5243_v50 = vld [vmem:[#allocation2 + $0xc] ss:$16 sps:$4 sm:$0xff]   ;;  %v6170_v51 = vpack.c.bf16 %v1245_v46, %v1245_v46  ;;  %v5324_v46 = vld [vmem:[#allocation2 + $0x5c4] ss:$16 sps:$4 sm:$0xff]  }
 0x13a   :  { %2548 = vmatprep.subr.bf16.mxu1 %v5156_v52  ;;  %2589 = vmatprep.subr.bf16.mxu0 %v5159_v53  ;;  %v6172_v52 = vpack.c.bf16 %v1247_v47, %v1247_v47  ;;  %v1250_v53 = vld [vmem:[%s6290_s0 + $0x28] sm:$0xff] }
 0x13b   :  { %v5327_v47 = vld [vmem:[#allocation2 + $0x1cc] ss:$16 sps:$4 sm:$0xff]  }
 0x13d   :  { %2549 = vmatpush1.bf16.msra.mxu1 %v5154_v54  ;;  %2590 = vmatpush1.bf16.msra.mxu0 %v5157_v55  ;;  %v5238_v54 = vld [vmem:[#allocation2 + $0x400] ss:$16 sps:$4 sm:$0xff]   ;;  %v5241_v55 = vld [vmem:[#allocation2 + $0x8] ss:$16 sps:$4 sm:$0xff]  }
 0x13e   :  { %2550 = vmatprep.subr.bf16.mxu1 %v5162_v56  ;;  %2591 = vmatprep.subr.bf16.mxu0 %v5165_v57  ;;  %v5246_v56 = vld [vmem:[#allocation2 + $0x424] ss:$16 sps:$4 sm:$0xff]   ;;  %v5249_v57 = vld [vmem:[#allocation2 + $0x2c] ss:$16 sps:$4 sm:$0xff]  }
 0x141   :  { %2551 = vmatpush1.bf16.msra.mxu1 %v5160_v58  ;;  %2592 = vmatpush1.bf16.msra.mxu0 %v5163_v59  ;;  %v6177_v58 = vpack.c.bf16 %v1250_v53, %v1250_v53  ;;  %v5244_v59 = vld [vmem:[#allocation2 + $0x420] ss:$16 sps:$4 sm:$0xff]   ;;  %v5330_v53 = vld [vmem:[#allocation2 + $0x5e4] ss:$16 sps:$4 sm:$0xff]  }
 0x142   :  { %2552 = vmatprep.subr.bf16.mxu1 %v5168_v60  ;;  %2593 = vmatprep.subr.bf16.mxu0 %v5171_v61  ;;  %v5247_v60 = vld [vmem:[#allocation2 + $0x28] ss:$16 sps:$4 sm:$0xff]   ;;  %v5252_v61 = vld [vmem:[#allocation2 + $0x444] ss:$16 sps:$4 sm:$0xff]  }
 0x145   :  { %2553 = vmatpush1.bf16.msra.mxu1 %v5166_v62  ;;  %2594 = vmatpush1.bf16.msra.mxu0 %v5169_v63  ;;  %v5255_v62 = vld [vmem:[#allocation2 + $0x4c] ss:$16 sps:$4 sm:$0xff]   ;;  %v5250_v63 = vld [vmem:[#allocation2 + $0x440] ss:$16 sps:$4 sm:$0xff]  }
 0x146   :  { %2554 = vmatprep.subr.bf16.mxu1 %v5174_v0  ;;  %2595 = vmatprep.subr.bf16.mxu0 %v5177_v1  ;;  %v5253_v0 = vld [vmem:[#allocation2 + $0x48] ss:$16 sps:$4 sm:$0xff]   ;;  %v5258_v1 = vld [vmem:[#allocation2 + $0x464] ss:$16 sps:$4 sm:$0xff]  }
 0x149   :  { %2555 = vmatpush1.bf16.msra.mxu1 %v5172_v2  ;;  %2596 = vmatpush1.bf16.msra.mxu0 %v5175_v3  ;;  %v5261_v2 = vld [vmem:[#allocation2 + $0x6c] ss:$16 sps:$4 sm:$0xff]   ;;  %v5256_v3 = vld [vmem:[#allocation2 + $0x460] ss:$16 sps:$4 sm:$0xff]  }
 0x14a   :  { %2556 = vmatprep.subr.bf16.mxu1 %v5180_v4  ;;  %2597 = vmatprep.subr.bf16.mxu0 %v5183_v5  ;;  %v5259_v4 = vld [vmem:[#allocation2 + $0x68] ss:$16 sps:$4 sm:$0xff]   ;;  %v5264_v5 = vld [vmem:[#allocation2 + $0x484] ss:$16 sps:$4 sm:$0xff]  }
 0x14d   :  { %2557 = vmatpush1.bf16.msra.mxu1 %v5178_v6  ;;  %2598 = vmatpush1.bf16.msra.mxu0 %v5181_v7  ;;  %v5267_v6 = vld [vmem:[#allocation2 + $0x8c] ss:$16 sps:$4 sm:$0xff]   ;;  %v5262_v7 = vld [vmem:[#allocation2 + $0x480] ss:$16 sps:$4 sm:$0xff]  }
 0x14e   :  { %2558 = vmatprep.subr.bf16.mxu1 %v5186_v8  ;;  %2599 = vmatprep.subr.bf16.mxu0 %v5189_v9  ;;  %v5270_v8 = vld [vmem:[#allocation2 + $0x4a4] ss:$16 sps:$4 sm:$0xff]   ;;  %v5273_v9 = vld [vmem:[#allocation2 + $0xac] ss:$16 sps:$4 sm:$0xff]  }
 0x151   :  { %2559 = vmatpush1.bf16.msra.mxu1 %v5184_v10  ;;  %2600 = vmatpush1.bf16.msra.mxu0 %v5187_v11  ;;  %v5268_v10 = vld [vmem:[#allocation2 + $0x4a0] ss:$16 sps:$4 sm:$0xff]   ;;  %v5271_v11 = vld [vmem:[#allocation2 + $0xa8] ss:$16 sps:$4 sm:$0xff]  }
 0x152   :  { %2560 = vmatprep.subr.bf16.mxu1 %v5192_v12  ;;  %2601 = vmatprep.subr.bf16.mxu0 %v5195_v13  ;;  %v5276_v12 = vld [vmem:[#allocation2 + $0x4c4] ss:$16 sps:$4 sm:$0xff]   ;;  %v5279_v13 = vld [vmem:[#allocation2 + $0xcc] ss:$16 sps:$4 sm:$0xff]  }
 0x155   :  { %2561 = vmatpush1.bf16.msra.mxu1 %v5190_v14  ;;  %2602 = vmatpush1.bf16.msra.mxu0 %v5193_v15  ;;  %v5274_v14 = vld [vmem:[#allocation2 + $0x4c0] ss:$16 sps:$4 sm:$0xff]   ;;  %v5277_v15 = vld [vmem:[#allocation2 + $0xc8] ss:$16 sps:$4 sm:$0xff]  }
 0x156   :  { %2562 = vmatprep.subr.bf16.mxu1 %v5198_v16  ;;  %2603 = vmatprep.subr.bf16.mxu0 %v5201_v17  ;;  %v5282_v16 = vld [vmem:[#allocation2 + $0x4e4] ss:$16 sps:$4 sm:$0xff]   ;;  %v5285_v17 = vld [vmem:[#allocation2 + $0xec] ss:$16 sps:$4 sm:$0xff]  }
 0x159   :  { %2563 = vmatpush1.bf16.msra.mxu1 %v5196_v18  ;;  %2604 = vmatpush1.bf16.msra.mxu0 %v5199_v19  ;;  %v5280_v18 = vld [vmem:[#allocation2 + $0x4e0] ss:$16 sps:$4 sm:$0xff]   ;;  %v5283_v19 = vld [vmem:[#allocation2 + $0xe8] ss:$16 sps:$4 sm:$0xff]  }
 0x15a   :  { %2564 = vmatprep.subr.bf16.mxu1 %v5204_v20  ;;  %2605 = vmatprep.subr.bf16.mxu0 %v5207_v21  ;;  %v5288_v20 = vld [vmem:[#allocation2 + $0x504] ss:$16 sps:$4 sm:$0xff]   ;;  %v5291_v21 = vld [vmem:[#allocation2 + $0x10c] ss:$16 sps:$4 sm:$0xff]  }
 0x15d   :  { %2565 = vmatpush1.bf16.msra.mxu1 %v5202_v22  ;;  %2606 = vmatpush1.bf16.msra.mxu0 %v5205_v23  ;;  %v5286_v22 = vld [vmem:[#allocation2 + $0x500] ss:$16 sps:$4 sm:$0xff]   ;;  %v5289_v23 = vld [vmem:[#allocation2 + $0x108] ss:$16 sps:$4 sm:$0xff]  }
 0x15e   :  { %2566 = vmatprep.subr.bf16.mxu1 %v5210_v24  ;;  %2607 = vmatprep.subr.bf16.mxu0 %v5213_v25  ;;  %v5294_v24 = vld [vmem:[#allocation2 + $0x524] ss:$16 sps:$4 sm:$0xff]   ;;  %v5297_v25 = vld [vmem:[#allocation2 + $0x12c] ss:$16 sps:$4 sm:$0xff]  }
 0x161   :  { %2567 = vmatpush1.bf16.msra.mxu1 %v5208_v27  ;;  %2608 = vmatpush1.bf16.msra.mxu0 %v5211_v29  ;;  %v5292_v27 = vld [vmem:[#allocation2 + $0x520] ss:$16 sps:$4 sm:$0xff]   ;;  %v5295_v29 = vld [vmem:[#allocation2 + $0x128] ss:$16 sps:$4 sm:$0xff]  }
 0x162   :  { %2568 = vmatprep.subr.bf16.mxu1 %v5216_v30  ;;  %2609 = vmatprep.subr.bf16.mxu0 %v5219_v31  ;;  %v5300_v30 = vld [vmem:[#allocation2 + $0x544] ss:$16 sps:$4 sm:$0xff]   ;;  %v5303_v31 = vld [vmem:[#allocation2 + $0x14c] ss:$16 sps:$4 sm:$0xff]  }
 0x165   :  { %2569 = vmatpush1.bf16.msra.mxu1 %v5214_v32  ;;  %2610 = vmatpush1.bf16.msra.mxu0 %v5217_v33  ;;  %v5298_v32 = vld [vmem:[#allocation2 + $0x540] ss:$16 sps:$4 sm:$0xff]   ;;  %v5301_v33 = vld [vmem:[#allocation2 + $0x148] ss:$16 sps:$4 sm:$0xff]  }
 0x166   :  { %2570 = vmatprep.subr.bf16.mxu1 %v5222_v34  ;;  %2611 = vmatprep.subr.bf16.mxu0 %v5225_v35  ;;  %v5306_v34 = vld [vmem:[#allocation2 + $0x564] ss:$16 sps:$4 sm:$0xff]   ;;  %v5309_v35 = vld [vmem:[#allocation2 + $0x16c] ss:$16 sps:$4 sm:$0xff]  }
 0x169   :  { %2571 = vmatpush1.bf16.msra.mxu1 %v5220_v36  ;;  %2612 = vmatpush1.bf16.msra.mxu0 %v5223_v37  ;;  %v5304_v36 = vld [vmem:[#allocation2 + $0x560] ss:$16 sps:$4 sm:$0xff]   ;;  %v5307_v37 = vld [vmem:[#allocation2 + $0x168] ss:$16 sps:$4 sm:$0xff]  }
 0x16a   :  { %2572 = vmatprep.subr.bf16.mxu1 %v5228_v38  ;;  %2613 = vmatprep.subr.bf16.mxu0 %v5231_v39  ;;  %v5312_v38 = vld [vmem:[#allocation2 + $0x584] ss:$16 sps:$4 sm:$0xff]   ;;  %v5315_v39 = vld [vmem:[#allocation2 + $0x18c] ss:$16 sps:$4 sm:$0xff]  }
 0x16d   :  { %2573 = vmatpush1.bf16.msra.mxu1 %v5226_v40  ;;  %2614 = vmatpush1.bf16.msra.mxu0 %v5229_v41  ;;  %v5310_v40 = vld [vmem:[#allocation2 + $0x580] ss:$16 sps:$4 sm:$0xff]   ;;  %v5313_v41 = vld [vmem:[#allocation2 + $0x188] ss:$16 sps:$4 sm:$0xff]  }
 0x16e   :  { %2574 = vmatprep.subr.bf16.mxu1 %v5234_v42  ;;  %2615 = vmatprep.subr.bf16.mxu0 %v5237_v43  ;;  %v5318_v42 = vld [vmem:[#allocation2 + $0x5a4] ss:$16 sps:$4 sm:$0xff]   ;;  %v5321_v43 = vld [vmem:[#allocation2 + $0x1ac] ss:$16 sps:$4 sm:$0xff]  }
 0x171   :  { %2575 = vmatpush1.bf16.msra.mxu1 %v5232_v44  ;;  %2616 = vmatpush1.bf16.msra.mxu0 %v5235_v45  ;;  %v5316_v44 = vld [vmem:[#allocation2 + $0x5a0] ss:$16 sps:$4 sm:$0xff]   ;;  %v5319_v45 = vld [vmem:[#allocation2 + $0x1a8] ss:$16 sps:$4 sm:$0xff]  }
 0x172   :  { %2626 = vmatprep.subr.bf16.mxu1 %v5240_v48  ;;  %2667 = vmatprep.subr.bf16.mxu0 %v5243_v50  ;;  %v5322_v48 = vld [vmem:[#allocation2 + $0x5c0] ss:$16 sps:$4 sm:$0xff]   ;;  %v5325_v50 = vld [vmem:[#allocation2 + $0x1c8] ss:$16 sps:$4 sm:$0xff]  }
 0x174   :  { %2577 = vmatmul.mubr.bf16.vlgmr.msra.gmra.mrb[20].mxu1 %v6170_v51  ;;  %2618 = vmatmul.mubr.bf16.vlgmr.msra.gmra.mrb[20].mxu0 %v6172_v52 }
 0x175   :  { %2627 = vmatpush1.bf16.msra.mxu1 %v5238_v54  ;;  %2668 = vmatpush1.bf16.msra.mxu0 %v5241_v55  ;;  %v5333_v54 = vld [vmem:[#allocation2 + $0x1ec] ss:$16 sps:$4 sm:$0xff]   ;;  %v5328_v55 = vld [vmem:[#allocation2 + $0x5e0] ss:$16 sps:$4 sm:$0xff]  }
 0x176   :  { %2628 = vmatprep.subr.bf16.mxu1 %v5246_v56  ;;  %2669 = vmatprep.subr.bf16.mxu0 %v5249_v57  ;;  %v5331_v56 = vld [vmem:[#allocation2 + $0x1e8] ss:$16 sps:$4 sm:$0xff]   ;;  %v1249_v57 = vld [vmem:[%s6290_s0 + $0x20] sm:$0xff] }
 0x177   :  { %2658 = vmatprep.mubr.bf16.mxu1 %v6177_v58  ;;  %2699 = vmatprep.mubr.bf16.mxu0 %v6158_v28  ;;  %v5265_v28 = vld [vmem:[#allocation2 + $0x88] ss:$16 sps:$4 sm:$0xff]  }
 0x179   :  { %2629 = vmatpush1.bf16.msra.mxu1 %v5244_v59  ;;  %2670 = vmatpush1.bf16.msra.mxu0 %v5247_v60  ;;  %v5336_v59 = vld [vmem:[#allocation2 + $0x20c] ss:$16 sps:$4 sm:$0xff]  }
 0x17a   :  { %2630 = vmatprep.subr.bf16.mxu1 %v5252_v61  ;;  %2671 = vmatprep.subr.bf16.mxu0 %v5255_v62  ;;  %v5339_v60 = vld [vmem:[#allocation2 + $0x40c] ss:$16 sps:$4 sm:$0xff]   ;;  %v6186_v61 = vpack.c.bf16 %v1249_v57, %v1249_v57  ;;  %v5334_v62 = vld [vmem:[#allocation2 + $0x208] ss:$16 sps:$4 sm:$0xff]  }
 0x17b   :  { %v5426_v57 = vld [vmem:[#allocation2 + $0x3ec] ss:$16 sps:$4 sm:$0xff]  }
 0x17d   :  { %2631 = vmatpush1.bf16.msra.mxu1 %v5250_v63  ;;  %2672 = vmatpush1.bf16.msra.mxu0 %v5253_v0  ;;  %v5337_v63 = vld [vmem:[#allocation2 + $0x408] ss:$16 sps:$4 sm:$0xff]   ;;  %v5342_v0 = vld [vmem:[#allocation2 + $0x22c] ss:$16 sps:$4 sm:$0xff]  }
 0x17e   :  { %2632 = vmatprep.subr.bf16.mxu1 %v5258_v1  ;;  %2673 = vmatprep.subr.bf16.mxu0 %v5261_v2  ;;  %v5345_v1 = vld [vmem:[#allocation2 + $0x42c] ss:$16 sps:$4 sm:$0xff]   ;;  %v5340_v2 = vld [vmem:[#allocation2 + $0x228] ss:$16 sps:$4 sm:$0xff]  }
 0x181   :  { %2633 = vmatpush1.bf16.msra.mxu1 %v5256_v3  ;;  %2674 = vmatpush1.bf16.msra.mxu0 %v5259_v4  ;;  %v5343_v3 = vld [vmem:[#allocation2 + $0x428] ss:$16 sps:$4 sm:$0xff]   ;;  %v5348_v4 = vld [vmem:[#allocation2 + $0x24c] ss:$16 sps:$4 sm:$0xff]  }
 0x182   :  { %2634 = vmatprep.subr.bf16.mxu1 %v5264_v5  ;;  %2675 = vmatprep.subr.bf16.mxu0 %v5267_v6  ;;  %v5351_v5 = vld [vmem:[#allocation2 + $0x44c] ss:$16 sps:$4 sm:$0xff]   ;;  %v5346_v6 = vld [vmem:[#allocation2 + $0x248] ss:$16 sps:$4 sm:$0xff]  }
 0x185   :  { %2635 = vmatpush1.bf16.msra.mxu1 %v5262_v7  ;;  %2676 = vmatpush1.bf16.msra.mxu0 %v5265_v28  ;;  %v5349_v7 = vld [vmem:[#allocation2 + $0x448] ss:$16 sps:$4 sm:$0xff]   ;;  %v5354_v28 = vld [vmem:[#allocation2 + $0x26c] ss:$16 sps:$4 sm:$0xff]  }
 0x186   :  { %2636 = vmatprep.subr.bf16.mxu1 %v5270_v8  ;;  %2677 = vmatprep.subr.bf16.mxu0 %v5273_v9  ;;  %v5352_v8 = vld [vmem:[#allocation2 + $0x268] ss:$16 sps:$4 sm:$0xff]  }
 0x187   :  { %v5355_v9 = vld [vmem:[#allocation2 + $0x468] ss:$16 sps:$4 sm:$0xff]  }
 0x189   :  { %2637 = vmatpush1.bf16.msra.mxu1 %v5268_v10  ;;  %2678 = vmatpush1.bf16.msra.mxu0 %v5271_v11  ;;  %v5360_v10 = vld [vmem:[#allocation2 + $0x28c] ss:$16 sps:$4 sm:$0xff]  }
 0x18a   :  { %2638 = vmatprep.subr.bf16.mxu1 %v5276_v12  ;;  %2679 = vmatprep.subr.bf16.mxu0 %v5279_v13  ;;  %v5363_v11 = vld [vmem:[#allocation2 + $0x48c] ss:$16 sps:$4 sm:$0xff]  }
 0x18b   :  { %v5366_v12 = vld [vmem:[#allocation2 + $0x2ac] ss:$16 sps:$4 sm:$0xff]  }
 0x18c   :  { %v5369_v13 = vld [vmem:[#allocation2 + $0x4ac] ss:$16 sps:$4 sm:$0xff]  }
 0x18d   :  { %2639 = vmatpush1.bf16.msra.mxu1 %v5274_v14  ;;  %2680 = vmatpush1.bf16.msra.mxu0 %v5277_v15  ;;  %v5364_v14 = vld [vmem:[#allocation2 + $0x2a8] ss:$16 sps:$4 sm:$0xff]  }
 0x18e   :  { %2640 = vmatprep.subr.bf16.mxu1 %v5282_v16  ;;  %2681 = vmatprep.subr.bf16.mxu0 %v5285_v17  ;;  %v5367_v15 = vld [vmem:[#allocation2 + $0x4a8] ss:$16 sps:$4 sm:$0xff]   ;;  %v5372_v16 = vld [vmem:[#allocation2 + $0x2cc] ss:$16 sps:$4 sm:$0xff]  }
 0x18f   :  { %v5375_v17 = vld [vmem:[#allocation2 + $0x4cc] ss:$16 sps:$4 sm:$0xff]  }
 0x191   :  { %2641 = vmatpush1.bf16.msra.mxu1 %v5280_v18  ;;  %2682 = vmatpush1.bf16.msra.mxu0 %v5283_v19  ;;  %v5370_v18 = vld [vmem:[#allocation2 + $0x2c8] ss:$16 sps:$4 sm:$0xff]  }
 0x192   :  { %2642 = vmatprep.subr.bf16.mxu1 %v5288_v20  ;;  %2683 = vmatprep.subr.bf16.mxu0 %v5291_v21  ;;  %v5373_v19 = vld [vmem:[#allocation2 + $0x4c8] ss:$16 sps:$4 sm:$0xff]   ;;  %v5378_v20 = vld [vmem:[#allocation2 + $0x2ec] ss:$16 sps:$4 sm:$0xff]  }
 0x193   :  { %v5381_v21 = vld [vmem:[#allocation2 + $0x4ec] ss:$16 sps:$4 sm:$0xff]  }
 0x195   :  { %2643 = vmatpush1.bf16.msra.mxu1 %v5286_v22  ;;  %2684 = vmatpush1.bf16.msra.mxu0 %v5289_v23  ;;  %v5376_v22 = vld [vmem:[#allocation2 + $0x2e8] ss:$16 sps:$4 sm:$0xff]  }
 0x196   :  { %2644 = vmatprep.subr.bf16.mxu1 %v5294_v24  ;;  %2685 = vmatprep.subr.bf16.mxu0 %v5297_v25  ;;  %v5379_v23 = vld [vmem:[#allocation2 + $0x4e8] ss:$16 sps:$4 sm:$0xff]   ;;  %v5384_v24 = vld [vmem:[#allocation2 + $0x30c] ss:$16 sps:$4 sm:$0xff]  }
 0x197   :  { %v5387_v25 = vld [vmem:[#allocation2 + $0x50c] ss:$16 sps:$4 sm:$0xff]  }
 0x199   :  { %2645 = vmatpush1.bf16.msra.mxu1 %v5292_v27  ;;  %2686 = vmatpush1.bf16.msra.mxu0 %v5295_v29  ;;  %v5382_v27 = vld [vmem:[#allocation2 + $0x308] ss:$16 sps:$4 sm:$0xff]  }
 0x19a   :  { %2646 = vmatprep.subr.bf16.mxu1 %v5300_v30  ;;  %2687 = vmatprep.subr.bf16.mxu0 %v5303_v31  ;;  %v5385_v29 = vld [vmem:[#allocation2 + $0x508] ss:$16 sps:$4 sm:$0xff]   ;;  %v5390_v30 = vld [vmem:[#allocation2 + $0x32c] ss:$16 sps:$4 sm:$0xff]  }
 0x19b   :  { %v5393_v31 = vld [vmem:[#allocation2 + $0x52c] ss:$16 sps:$4 sm:$0xff]  }
 0x19d   :  { %2647 = vmatpush1.bf16.msra.mxu1 %v5298_v32  ;;  %2688 = vmatpush1.bf16.msra.mxu0 %v5301_v33  ;;  %v5388_v32 = vld [vmem:[#allocation2 + $0x328] ss:$16 sps:$4 sm:$0xff]  }
 0x19e   :  { %2648 = vmatprep.subr.bf16.mxu1 %v5306_v34  ;;  %2689 = vmatprep.subr.bf16.mxu0 %v5309_v35  ;;  %v5391_v33 = vld [vmem:[#allocation2 + $0x528] ss:$16 sps:$4 sm:$0xff]   ;;  %v5396_v34 = vld [vmem:[#allocation2 + $0x34c] ss:$16 sps:$4 sm:$0xff]  }
 0x19f   :  { %v5399_v35 = vld [vmem:[#allocation2 + $0x54c] ss:$16 sps:$4 sm:$0xff]  }
 0x1a1   :  { %2649 = vmatpush1.bf16.msra.mxu1 %v5304_v36  ;;  %2690 = vmatpush1.bf16.msra.mxu0 %v5307_v37  ;;  %v5394_v36 = vld [vmem:[#allocation2 + $0x348] ss:$16 sps:$4 sm:$0xff]  }
 0x1a2   :  { %2650 = vmatprep.subr.bf16.mxu1 %v5312_v38  ;;  %2691 = vmatprep.subr.bf16.mxu0 %v5315_v39  ;;  %v5397_v37 = vld [vmem:[#allocation2 + $0x548] ss:$16 sps:$4 sm:$0xff]   ;;  %v5402_v38 = vld [vmem:[#allocation2 + $0x36c] ss:$16 sps:$4 sm:$0xff]  }
 0x1a3   :  { %v5405_v39 = vld [vmem:[#allocation2 + $0x56c] ss:$16 sps:$4 sm:$0xff]  }
 0x1a5   :  { %2651 = vmatpush1.bf16.msra.mxu1 %v5310_v40  ;;  %2692 = vmatpush1.bf16.msra.mxu0 %v5313_v41  ;;  %v5400_v40 = vld [vmem:[#allocation2 + $0x368] ss:$16 sps:$4 sm:$0xff]  }
 0x1a6   :  { %2652 = vmatprep.subr.bf16.mxu1 %v5318_v42  ;;  %2693 = vmatprep.subr.bf16.mxu0 %v5321_v43  ;;  %v5403_v41 = vld [vmem:[#allocation2 + $0x568] ss:$16 sps:$4 sm:$0xff]   ;;  %v5408_v42 = vld [vmem:[#allocation2 + $0x38c] ss:$16 sps:$4 sm:$0xff]  }
 0x1a7   :  { %v5411_v43 = vld [vmem:[#allocation2 + $0x58c] ss:$16 sps:$4 sm:$0xff]  }
 0x1a9   :  { %2653 = vmatpush1.bf16.msra.mxu1 %v5316_v44  ;;  %2694 = vmatpush1.bf16.msra.mxu0 %v5319_v45  ;;  %v5406_v44 = vld [vmem:[#allocation2 + $0x388] ss:$16 sps:$4 sm:$0xff]  }
 0x1aa   :  { %2654 = vmatprep.subr.bf16.mxu1 %v5324_v46  ;;  %2695 = vmatprep.subr.bf16.mxu0 %v5327_v47  ;;  %v5409_v45 = vld [vmem:[#allocation2 + $0x588] ss:$16 sps:$4 sm:$0xff]   ;;  %v5414_v46 = vld [vmem:[#allocation2 + $0x3ac] ss:$16 sps:$4 sm:$0xff]  }
 0x1ab   :  { %v5417_v47 = vld [vmem:[#allocation2 + $0x5ac] ss:$16 sps:$4 sm:$0xff]  }
 0x1ad   :  { %2655 = vmatpush1.bf16.msra.mxu1 %v5322_v48  ;;  %2696 = vmatpush1.bf16.msra.mxu0 %v5325_v50  ;;  %v5412_v48 = vld [vmem:[#allocation2 + $0x3a8] ss:$16 sps:$4 sm:$0xff]  }
 0x1ae   :  { %2656 = vmatprep.subr.bf16.mxu1 %v5330_v53  ;;  %2697 = vmatprep.subr.bf16.mxu0 %v5333_v54  ;;  %v5415_v50 = vld [vmem:[#allocation2 + $0x5a8] ss:$16 sps:$4 sm:$0xff]   ;;  %v5420_v53 = vld [vmem:[#allocation2 + $0x3cc] ss:$16 sps:$4 sm:$0xff]  }
 0x1af   :  { %v5423_v54 = vld [vmem:[#allocation2 + $0x5cc] ss:$16 sps:$4 sm:$0xff]  }
 0x1b1   :  { %2657 = vmatpush1.bf16.msra.mxu1 %v5328_v55  ;;  %2698 = vmatpush1.bf16.msra.mxu0 %v5331_v56  ;;  %v5418_v55 = vld [vmem:[#allocation2 + $0x3c8] ss:$16 sps:$4 sm:$0xff]  }
 0x1b2   :  { %2708 = vmatprep.subr.bf16.mxu1 %v5336_v59  ;;  %2749 = vmatprep.subr.bf16.mxu0 %v5339_v60  ;;  %v5421_v56 = vld [vmem:[#allocation2 + $0x5c8] ss:$16 sps:$4 sm:$0xff]   ;;  %v5429_v59 = vld [vmem:[#allocation2 + $0x5ec] ss:$16 sps:$4 sm:$0xff]  }
 0x1b3   :  { %v5424_v60 = vld [vmem:[#allocation2 + $0x3e8] ss:$16 sps:$4 sm:$0xff]  }
 0x1b4   :  { %2659 = vmatmul.mubr.bf16.vlgmr.msra.gmra.mrb[24].mxu1 %v6186_v61  ;;  %2700 = vmatmul.mubr.bf16.vlgmr.msra.gmra.mrb[24].mxu0 %v6170_v51  ;;  %v5357_v51 = vld [vmem:[#allocation2 + $0x46c] ss:$16 sps:$4 sm:$0xff]  }
 0x1b5   :  { %2709 = vmatpush1.bf16.msra.mxu1 %v5334_v62  ;;  %2750 = vmatpush1.bf16.msra.mxu0 %v5337_v63  ;;  %v5427_v62 = vld [vmem:[#allocation2 + $0x5e8] ss:$16 sps:$4 sm:$0xff]   ;;  %v5432_v63 = vld [vmem:[#allocation5 + $0x4] ss:$16 sps:$4 sm:$0xff]  }
 0x1b6   :  { %2710 = vmatprep.subr.bf16.mxu1 %v5342_v0  ;;  %2751 = vmatprep.subr.bf16.mxu0 %v5345_v1  ;;  %v5435_v0 = vld [vmem:[#allocation5 + $0x204] ss:$16 sps:$4 sm:$0xff]   ;;  %v2791_v1 = vld [vmem:[%s6292_s2 + $0x8] sm:$0xff] }
 0x1b7   :  { %2740 = vmatprep.mubr.bf16.mxu1 %v6160_v49  ;;  %2781 = vmatprep.mubr.bf16.mxu0 %v6177_v58  ;;  %v5358_v49 = vld [vmem:[#allocation2 + $0x288] ss:$16 sps:$4 sm:$0xff]  }
 0x1b8   :  { %v5361_v58 = vld [vmem:[#allocation2 + $0x488] ss:$16 sps:$4 sm:$0xff]  }
 0x1b9   :  { %2711 = vmatpush1.bf16.msra.mxu1 %v5340_v2  ;;  %2752 = vmatpush1.bf16.msra.mxu0 %v5343_v3  ;;  %v5430_v2 = vld [vmem:[#allocation5] ss:$16 sps:$4 sm:$0xff]  }
 0x1ba   :  { %2712 = vmatprep.subr.bf16.mxu1 %v5348_v4  ;;  %2753 = vmatprep.subr.bf16.mxu0 %v5351_v5  ;;  %v5433_v3 = vld [vmem:[#allocation5 + $0x200] ss:$16 sps:$4 sm:$0xff]   ;;  %v5438_v4 = vld [vmem:[#allocation5 + $0x24] ss:$16 sps:$4 sm:$0xff]  }
 0x1bb   :  { %v5441_v5 = vld [vmem:[#allocation5 + $0x224] ss:$16 sps:$4 sm:$0xff]  }
 0x1bd   :  { %2713 = vmatpush1.bf16.msra.mxu1 %v5346_v6  ;;  %2754 = vmatpush1.bf16.msra.mxu0 %v5349_v7  ;;  %v6195_v6 = vpack.c.bf16 %v2791_v1, %v2791_v1  ;;  %v5436_v7 = vld [vmem:[#allocation5 + $0x20] ss:$16 sps:$4 sm:$0xff]   ;;  %v5513_v1 = vld [vmem:[#allocation5 + $0xac] ss:$16 sps:$4 sm:$0xff]  }
 0x1be   :  { %2714 = vmatprep.subr.bf16.mxu1 %v5354_v28  ;;  %2755 = vmatprep.subr.bf16.mxu0 %v5357_v51  ;;  %v5439_v28 = vld [vmem:[#allocation5 + $0x220] ss:$16 sps:$4 sm:$0xff]   ;;  %v5444_v51 = vld [vmem:[#allocation5 + $0x44] ss:$16 sps:$4 sm:$0xff]  }
 0x1c1   :  { %2715 = vmatpush1.bf16.msra.mxu1 %v5352_v8  ;;  %2756 = vmatpush1.bf16.msra.mxu0 %v5355_v9  ;;  %v5447_v8 = vld [vmem:[#allocation5 + $0x244] ss:$16 sps:$4 sm:$0xff]   ;;  %v5442_v9 = vld [vmem:[#allocation5 + $0x40] ss:$16 sps:$4 sm:$0xff]  }
 0x1c2   :  { %2716 = vmatprep.subr.bf16.mxu1 %v5360_v10  ;;  %2757 = vmatprep.subr.bf16.mxu0 %v5363_v11  ;;  %v5445_v10 = vld [vmem:[#allocation5 + $0x240] ss:$16 sps:$4 sm:$0xff]  }
 0x1c3   :  { %v5448_v11 = vld [vmem:[#allocation5 + $0x60] ss:$16 sps:$4 sm:$0xff]  }
 0x1c5   :  { %2717 = vmatpush1.bf16.msra.mxu1 %v5358_v49  ;;  %2758 = vmatpush1.bf16.msra.mxu0 %v5361_v58  ;;  %v5451_v49 = vld [vmem:[#allocation5 + $0x260] ss:$16 sps:$4 sm:$0xff]   ;;  %v5456_v58 = vld [vmem:[#allocation5 + $0x84] ss:$16 sps:$4 sm:$0xff]  }
 0x1c6   :  { %2718 = vmatprep.subr.bf16.mxu1 %v5366_v12  ;;  %2759 = vmatprep.subr.bf16.mxu0 %v5369_v13  ;;  %v5459_v12 = vld [vmem:[#allocation5 + $0x284] ss:$16 sps:$4 sm:$0xff]   ;;  %v5454_v13 = vld [vmem:[#allocation5 + $0x80] ss:$16 sps:$4 sm:$0xff]  }
 0x1c9   :  { %2719 = vmatpush1.bf16.msra.mxu1 %v5364_v14  ;;  %2760 = vmatpush1.bf16.msra.mxu0 %v5367_v15  ;;  %v5457_v14 = vld [vmem:[#allocation5 + $0x280] ss:$16 sps:$4 sm:$0xff]   ;;  %v5462_v15 = vld [vmem:[#allocation5 + $0xa4] ss:$16 sps:$4 sm:$0xff]  }
 0x1ca   :  { %2720 = vmatprep.subr.bf16.mxu1 %v5372_v16  ;;  %2761 = vmatprep.subr.bf16.mxu0 %v5375_v17  ;;  %v5465_v16 = vld [vmem:[#allocation5 + $0x2a4] ss:$16 sps:$4 sm:$0xff]   ;;  %v5460_v17 = vld [vmem:[#allocation5 + $0xa0] ss:$16 sps:$4 sm:$0xff]  }
 0x1cd   :  { %2721 = vmatpush1.bf16.msra.mxu1 %v5370_v18  ;;  %2762 = vmatpush1.bf16.msra.mxu0 %v5373_v19  ;;  %v5463_v18 = vld [vmem:[#allocation5 + $0x2a0] ss:$16 sps:$4 sm:$0xff]   ;;  %v5468_v19 = vld [vmem:[#allocation5 + $0xc4] ss:$16 sps:$4 sm:$0xff]  }
 0x1ce   :  { %2722 = vmatprep.subr.bf16.mxu1 %v5378_v20  ;;  %2763 = vmatprep.subr.bf16.mxu0 %v5381_v21  ;;  %v5471_v20 = vld [vmem:[#allocation5 + $0x2c4] ss:$16 sps:$4 sm:$0xff]  }
 0x1d1   :  { %2723 = vmatpush1.bf16.msra.mxu1 %v5376_v22  ;;  %2764 = vmatpush1.bf16.msra.mxu0 %v5379_v23 }
 0x1d2   :  { %2724 = vmatprep.subr.bf16.mxu1 %v5384_v24  ;;  %2765 = vmatprep.subr.bf16.mxu0 %v5387_v25 }
 0x1d5   :  { %2725 = vmatpush1.bf16.msra.mxu1 %v5382_v27  ;;  %2766 = vmatpush1.bf16.msra.mxu0 %v5385_v29  ;;  %v5466_v29 = vld [vmem:[#allocation5 + $0xc0] ss:$16 sps:$4 sm:$0xff]  }
 0x1d6   :  { %2726 = vmatprep.subr.bf16.mxu1 %v5390_v30  ;;  %2767 = vmatprep.subr.bf16.mxu0 %v5393_v31  ;;  %v5469_v30 = vld [vmem:[#allocation5 + $0x2c0] ss:$16 sps:$4 sm:$0xff]  }
 0x1d9   :  { %2727 = vmatpush1.bf16.msra.mxu1 %v5388_v32  ;;  %2768 = vmatpush1.bf16.msra.mxu0 %v5391_v33  ;;  %v5474_v33 = vld [vmem:[#allocation5 + $0xe4] ss:$16 sps:$4 sm:$0xff]  }
 0x1da   :  { %2728 = vmatprep.subr.bf16.mxu1 %v5396_v34  ;;  %2769 = vmatprep.subr.bf16.mxu0 %v5399_v35  ;;  %v5477_v34 = vld [vmem:[#allocation5 + $0x2e4] ss:$16 sps:$4 sm:$0xff]   ;;  %v5472_v35 = vld [vmem:[#allocation5 + $0xe0] ss:$16 sps:$4 sm:$0xff]  }
 0x1dd   :  { %2729 = vmatpush1.bf16.msra.mxu1 %v5394_v36  ;;  %2770 = vmatpush1.bf16.msra.mxu0 %v5397_v37  ;;  %v5475_v36 = vld [vmem:[#allocation5 + $0x2e0] ss:$16 sps:$4 sm:$0xff]  }
 0x1de   :  { %2730 = vmatprep.subr.bf16.mxu1 %v5402_v38  ;;  %2771 = vmatprep.subr.bf16.mxu0 %v5405_v39  ;;  %v2792_v37 = vld [vmem:[%s6292_s2 + $0x10] sm:$0xff]  ;;  %v5483_v39 = vld [vmem:[#allocation5 + $0xc] ss:$16 sps:$4 sm:$0xff]  }
 0x1df   :  { %v5480_v38 = vld [vmem:[#allocation5 + $0x104] ss:$16 sps:$4 sm:$0xff]  }
 0x1e1   :  { %2731 = vmatpush1.bf16.msra.mxu1 %v5400_v40  ;;  %2772 = vmatpush1.bf16.msra.mxu0 %v5403_v41  ;;  %v6212_v40 = vpack.c.bf16 %v2792_v37, %v2792_v37  ;;  %v5478_v41 = vld [vmem:[#allocation5 + $0x100] ss:$16 sps:$4 sm:$0xff]   ;;  %v5564_v37 = vld [vmem:[#allocation5 + $0x1cc] ss:$16 sps:$4 sm:$0xff]  }
 0x1e2   :  { %2732 = vmatprep.subr.bf16.mxu1 %v5408_v42  ;;  %2773 = vmatprep.subr.bf16.mxu0 %v5411_v43  ;;  %v5481_v42 = vld [vmem:[#allocation5 + $0x8] ss:$16 sps:$4 sm:$0xff]   ;;  %v5486_v43 = vld [vmem:[#allocation5 + $0x124] ss:$16 sps:$4 sm:$0xff]  }
 0x1e5   :  { %2733 = vmatpush1.bf16.msra.mxu1 %v5406_v44  ;;  %2774 = vmatpush1.bf16.msra.mxu0 %v5409_v45  ;;  %v5489_v44 = vld [vmem:[#allocation5 + $0x2c] ss:$16 sps:$4 sm:$0xff]   ;;  %v5484_v45 = vld [vmem:[#allocation5 + $0x120] ss:$16 sps:$4 sm:$0xff]  }
 0x1e6   :  { %2734 = vmatprep.subr.bf16.mxu1 %v5414_v46  ;;  %2775 = vmatprep.subr.bf16.mxu0 %v5417_v47  ;;  %v5487_v46 = vld [vmem:[#allocation5 + $0x28] ss:$16 sps:$4 sm:$0xff]   ;;  %v5492_v47 = vld [vmem:[#allocation5 + $0x144] ss:$16 sps:$4 sm:$0xff]  }
 0x1e9   :  { %2735 = vmatpush1.bf16.msra.mxu1 %v5412_v48  ;;  %2776 = vmatpush1.bf16.msra.mxu0 %v5415_v50  ;;  %v5495_v48 = vld [vmem:[#allocation5 + $0x4c] ss:$16 sps:$4 sm:$0xff]   ;;  %v5490_v50 = vld [vmem:[#allocation5 + $0x140] ss:$16 sps:$4 sm:$0xff]  }
 0x1ea   :  { %2736 = vmatprep.subr.bf16.mxu1 %v5420_v53  ;;  %2777 = vmatprep.subr.bf16.mxu0 %v5423_v54  ;;  %v5493_v53 = vld [vmem:[#allocation5 + $0x48] ss:$16 sps:$4 sm:$0xff]   ;;  %v5498_v54 = vld [vmem:[#allocation5 + $0x164] ss:$16 sps:$4 sm:$0xff]  }
 0x1ed   :  { %2737 = vmatpush1.bf16.msra.mxu1 %v5418_v55  ;;  %2778 = vmatpush1.bf16.msra.mxu0 %v5421_v56  ;;  %v5501_v55 = vld [vmem:[#allocation5 + $0x6c] ss:$16 sps:$4 sm:$0xff]   ;;  %v5496_v56 = vld [vmem:[#allocation5 + $0x160] ss:$16 sps:$4 sm:$0xff]  }
 0x1ee   :  { %2738 = vmatprep.subr.bf16.mxu1 %v5426_v57  ;;  %2779 = vmatprep.subr.bf16.mxu0 %v5429_v59  ;;  %v5499_v57 = vld [vmem:[#allocation5 + $0x68] ss:$16 sps:$4 sm:$0xff]   ;;  %v5504_v59 = vld [vmem:[#allocation5 + $0x184] ss:$16 sps:$4 sm:$0xff]  }
 0x1f1   :  { %2739 = vmatpush1.bf16.msra.mxu1 %v5424_v60  ;;  %2780 = vmatpush1.bf16.msra.mxu0 %v5427_v62  ;;  %v5507_v60 = vld [vmem:[#allocation5 + $0x8c] ss:$16 sps:$4 sm:$0xff]   ;;  %v5502_v62 = vld [vmem:[#allocation5 + $0x180] ss:$16 sps:$4 sm:$0xff]  }
 0x1f2   :  { %3372 = vmatprep.subr.bf16.mxu1 %v5432_v63  ;;  %3413 = vmatprep.subr.bf16.mxu0 %v5435_v0  ;;  %v5505_v63 = vld [vmem:[#allocation5 + $0x88] ss:$16 sps:$4 sm:$0xff]   ;;  %v5510_v0 = vld [vmem:[#allocation5 + $0x1a4] ss:$16 sps:$4 sm:$0xff]  }
 0x1f4   :  { %2741 = vmatmul.mubr.bf16.vlgmr.msra.gmra.mrb[28].mxu1 %v6172_v52  ;;  %2782 = vmatmul.mubr.bf16.vlgmr.msra.gmra.mrb[28].mxu0 %v6186_v61  ;;  %v5450_v52 = vld [vmem:[#allocation5 + $0x64] ss:$16 sps:$4 sm:$0xff]  }
 0x1f5   :  { %3373 = vmatpush1.bf16.msra.mxu1 %v5430_v2  ;;  %3414 = vmatpush1.bf16.msra.mxu0 %v5433_v3  ;;  %v5453_v61 = vld [vmem:[#allocation5 + $0x264] ss:$16 sps:$4 sm:$0xff]   ;;  %v5508_v2 = vld [vmem:[#allocation5 + $0x1a0] ss:$16 sps:$4 sm:$0xff]   ;;  %v5511_v3 = vld [vmem:[#allocation5 + $0xa8] ss:$16 sps:$4 sm:$0xff]  }
 0x1f6   :  { %3374 = vmatprep.subr.bf16.mxu1 %v5438_v4  ;;  %3415 = vmatprep.subr.bf16.mxu0 %v5441_v5  ;;  %v5516_v4 = vld [vmem:[#allocation5 + $0x1c4] ss:$16 sps:$4 sm:$0xff]   ;;  %v5519_v5 = vld [vmem:[#allocation5 + $0xcc] ss:$16 sps:$4 sm:$0xff]  }
 0x1f7   :  { %3445 = vmatprep.mubr.bf16.mxu0 %v5867_v26  ;;  %3404 = vmatprep.mubr.bf16.mxu1 %v6195_v6 }
 0x1f9   :  { %3375 = vmatpush1.bf16.msra.mxu1 %v5436_v7  ;;  %3416 = vmatpush1.bf16.msra.mxu0 %v5439_v28  ;;  %v5517_v7 = vld [vmem:[#allocation5 + $0xc8] ss:$16 sps:$4 sm:$0xff]   ;;  %v5522_v28 = vld [vmem:[#allocation5 + $0x1e4] ss:$16 sps:$4 sm:$0xff]  }
 0x1fa   :  { %3376 = vmatprep.subr.bf16.mxu1 %v5444_v51  ;;  %3417 = vmatprep.subr.bf16.mxu0 %v5447_v8  ;;  %v5525_v51 = vld [vmem:[#allocation5 + $0xec] ss:$16 sps:$4 sm:$0xff]   ;;  %v5520_v8 = vld [vmem:[#allocation5 + $0x1e0] ss:$16 sps:$4 sm:$0xff]  }
 0x1fd   :  { %3377 = vmatpush1.bf16.msra.mxu1 %v5442_v9  ;;  %3418 = vmatpush1.bf16.msra.mxu0 %v5445_v10  ;;  %v5523_v9 = vld [vmem:[#allocation5 + $0xe8] ss:$16 sps:$4 sm:$0xff]   ;;  %v2790_v10 = vld [vmem:[%s6292_s2] sm:$0xff] }
 0x1fe   :  { %3378 = vmatprep.subr.bf16.mxu1 %v5450_v52  ;;  %3419 = vmatprep.subr.bf16.mxu0 %v5453_v61  ;;  %v5528_v52 = vld [vmem:[#allocation5 + $0x10c] ss:$16 sps:$4 sm:$0xff]  }
 0x1ff   :  { %v5531_v61 = vld [vmem:[#allocation5 + $0x20c] ss:$16 sps:$4 sm:$0xff]  }
 0x201   :  { %3379 = vmatpush1.bf16.msra.mxu1 %v5448_v11  ;;  %3420 = vmatpush1.bf16.msra.mxu0 %v5451_v49  ;;  %v6219_v11 = vpack.c.bf16 %v2790_v10, %v2790_v10  ;;  %v5526_v49 = vld [vmem:[#allocation5 + $0x108] ss:$16 sps:$4 sm:$0xff]   ;;  %v5600_v10 = vld [vmem:[#allocation7 + $0x84] ss:$16 sps:$4 sm:$0xff]  }
 0x202   :  { %3380 = vmatprep.subr.bf16.mxu1 %v5456_v58  ;;  %3421 = vmatprep.subr.bf16.mxu0 %v5459_v12  ;;  %v5529_v58 = vld [vmem:[#allocation5 + $0x208] ss:$16 sps:$4 sm:$0xff]   ;;  %v5534_v12 = vld [vmem:[#allocation5 + $0x12c] ss:$16 sps:$4 sm:$0xff]  }
 0x205   :  { %3381 = vmatpush1.bf16.msra.mxu1 %v5454_v13  ;;  %3422 = vmatpush1.bf16.msra.mxu0 %v5457_v14  ;;  %v5537_v13 = vld [vmem:[#allocation5 + $0x22c] ss:$16 sps:$4 sm:$0xff]   ;;  %v5532_v14 = vld [vmem:[#allocation5 + $0x128] ss:$16 sps:$4 sm:$0xff]  }
 0x206   :  { %3382 = vmatprep.subr.bf16.mxu1 %v5462_v15  ;;  %3423 = vmatprep.subr.bf16.mxu0 %v5465_v16  ;;  %v5535_v15 = vld [vmem:[#allocation5 + $0x228] ss:$16 sps:$4 sm:$0xff]   ;;  %v5540_v16 = vld [vmem:[#allocation5 + $0x14c] ss:$16 sps:$4 sm:$0xff]  }
 0x207   :  { %v6201_v21 = vpop.f32.mrb[16].mxu1  ;;  %v6203_v22 = vpop.f32.mrb[16].mxu0 }
 0x208   :  { %v6205_v23 = vpop.f32.mrb[17].mxu1  ;;  %v6207_v24 = vpop.f32.mrb[17].mxu0 }
 0x209   :  { %3383 = vmatpush1.bf16.msra.mxu1 %v5460_v17  ;;  %3424 = vmatpush1.bf16.msra.mxu0 %v5463_v18  ;;  %v1540_v25 = vpop.f32.mrb[18].mxu1  ;;  %v1581_v27 = vpop.f32.mrb[18].mxu0  ;;  %v5543_v17 = vld [vmem:[#allocation5 + $0x24c] ss:$16 sps:$4 sm:$0xff]   ;;  %v5538_v18 = vld [vmem:[#allocation5 + $0x148] ss:$16 sps:$4 sm:$0xff]  }
 0x20a   :  { %v1541_v31 = vpop.f32.mrb[19].mxu1  ;;  %v1582_v32 = vpop.f32.mrb[19].mxu0  ;;  %3384 = vmatprep.subr.bf16.mxu1 %v5468_v19  ;;  %3425 = vmatprep.subr.bf16.mxu0 %v5471_v20  ;;  %v5541_v19 = vld [vmem:[#allocation5 + $0x248] ss:$16 sps:$4 sm:$0xff]   ;;  %v5546_v20 = vld [vmem:[#allocation5 + $0x16c] ss:$16 sps:$4 sm:$0xff]  }
 0x20b   :  { %v5549_v25 = vld [vmem:[#allocation5 + $0x26c] ss:$16 sps:$4 sm:$0xff]   ;;  %v5544_v27 = vld [vmem:[#allocation5 + $0x168] ss:$16 sps:$4 sm:$0xff]  }
 0x20c   :  { %v5555_v31 = vld [vmem:[#allocation5 + $0x28c] ss:$16 sps:$4 sm:$0xff]   ;;  %v5550_v32 = vld [vmem:[#allocation5 + $0x188] ss:$16 sps:$4 sm:$0xff]  }
 0x20d   :  { %3385 = vmatpush1.bf16.msra.mxu1 %v5466_v29  ;;  %3426 = vmatpush1.bf16.msra.mxu0 %v5469_v30  ;;  %v5547_v29 = vld [vmem:[#allocation5 + $0x268] ss:$16 sps:$4 sm:$0xff]   ;;  %v5552_v30 = vld [vmem:[#allocation5 + $0x18c] ss:$16 sps:$4 sm:$0xff]  }
 0x20e   :  { %3386 = vmatprep.subr.bf16.mxu1 %v5474_v33  ;;  %3427 = vmatprep.subr.bf16.mxu0 %v5477_v34  ;;  %v5558_v33 = vld [vmem:[#allocation5 + $0x1ac] ss:$16 sps:$4 sm:$0xff]  }
 0x20f   :  { %v5561_v34 = vld [vmem:[#allocation5 + $0x2ac] ss:$16 sps:$4 sm:$0xff]  }
 0x211   :  { %3387 = vmatpush1.bf16.msra.mxu1 %v5472_v35  ;;  %3428 = vmatpush1.bf16.msra.mxu0 %v5475_v36  ;;  %v5556_v35 = vld [vmem:[#allocation5 + $0x1a8] ss:$16 sps:$4 sm:$0xff]  }
 0x212   :  { %3388 = vmatprep.subr.bf16.mxu1 %v5480_v38  ;;  %3454 = vmatprep.subr.bf16.mxu0 %v5483_v39  ;;  %v5559_v36 = vld [vmem:[#allocation5 + $0x2a8] ss:$16 sps:$4 sm:$0xff]   ;;  %v5567_v38 = vld [vmem:[#allocation5 + $0x2cc] ss:$16 sps:$4 sm:$0xff]  }
 0x214   :  { %3446 = vmatmul.mubr.bf16.vlgmr.msra.gmra.mrb[32].mxu0 %v6212_v40 }
 0x215   :  { %3389 = vmatpush1.bf16.msra.mxu1 %v5478_v41  ;;  %3455 = vmatpush1.bf16.msra.mxu0 %v5481_v42 }
 0x216   :  { %3390 = vmatprep.subr.bf16.mxu1 %v5486_v43  ;;  %3456 = vmatprep.subr.bf16.mxu0 %v5489_v44 }
 0x217   :  { %3486 = vmatprep.mubr.bf16.mxu0 %v6195_v6  ;;  %v5514_v6 = vld [vmem:[#allocation5 + $0x1c0] ss:$16 sps:$4 sm:$0xff]  }
 0x219   :  { %3391 = vmatpush1.bf16.msra.mxu1 %v5484_v45  ;;  %3457 = vmatpush1.bf16.msra.mxu0 %v5487_v46 }
 0x21a   :  { %3392 = vmatprep.subr.bf16.mxu1 %v5492_v47  ;;  %3458 = vmatprep.subr.bf16.mxu0 %v5495_v48  ;;  %v5562_v47 = vld [vmem:[#allocation5 + $0x1c8] ss:$16 sps:$4 sm:$0xff]  }
 0x21b   :  { %v5565_v48 = vld [vmem:[#allocation5 + $0x2c8] ss:$16 sps:$4 sm:$0xff]  }
 0x21d   :  { %3393 = vmatpush1.bf16.msra.mxu1 %v5490_v50  ;;  %3459 = vmatpush1.bf16.msra.mxu0 %v5493_v53 }
 0x21e   :  { %3394 = vmatprep.subr.bf16.mxu1 %v5498_v54  ;;  %3460 = vmatprep.subr.bf16.mxu0 %v5501_v55  ;;  %v5570_v55 = vld [vmem:[#allocation5 + $0x1ec] ss:$16 sps:$4 sm:$0xff]  }
 0x221   :  { %3395 = vmatpush1.bf16.msra.mxu1 %v5496_v56  ;;  %3461 = vmatpush1.bf16.msra.mxu0 %v5499_v57  ;;  %v5573_v56 = vld [vmem:[#allocation5 + $0x2ec] ss:$16 sps:$4 sm:$0xff]  }
 0x222   :  { %3396 = vmatprep.subr.bf16.mxu1 %v5504_v59  ;;  %3462 = vmatprep.subr.bf16.mxu0 %v5507_v60  ;;  %v5576_v60 = vld [vmem:[#allocation7 + $0x4] ss:$16 sps:$4 sm:$0xff]  }
 0x225   :  { %3397 = vmatpush1.bf16.msra.mxu1 %v5502_v62  ;;  %3463 = vmatpush1.bf16.msra.mxu0 %v5505_v63  ;;  %v5579_v62 = vld [vmem:[#allocation7 + $0xc] ss:$16 sps:$4 sm:$0xff]   ;;  %v5574_v63 = vld [vmem:[#allocation7] ss:$16 sps:$4 sm:$0xff]  }
 0x226   :  { %3398 = vmatprep.subr.bf16.mxu1 %v5510_v0  ;;  %3464 = vmatprep.subr.bf16.mxu0 %v5513_v1  ;;  %v5577_v0 = vld [vmem:[#allocation7 + $0x8] ss:$16 sps:$4 sm:$0xff]   ;;  %v5582_v1 = vld [vmem:[#allocation7 + $0x24] ss:$16 sps:$4 sm:$0xff]  }
 0x229   :  { %3399 = vmatpush1.bf16.msra.mxu1 %v5508_v2  ;;  %3465 = vmatpush1.bf16.msra.mxu0 %v5511_v3  ;;  %v5585_v2 = vld [vmem:[#allocation7 + $0x2c] ss:$16 sps:$4 sm:$0xff]   ;;  %v5580_v3 = vld [vmem:[#allocation7 + $0x20] ss:$16 sps:$4 sm:$0xff]  }
 0x22a   :  { %3400 = vmatprep.subr.bf16.mxu1 %v5516_v4  ;;  %3466 = vmatprep.subr.bf16.mxu0 %v5519_v5  ;;  %v5583_v4 = vld [vmem:[#allocation7 + $0x28] ss:$16 sps:$4 sm:$0xff]   ;;  %v5588_v5 = vld [vmem:[#allocation7 + $0x44] ss:$16 sps:$4 sm:$0xff]  }
 0x22d   :  { %3401 = vmatpush1.bf16.msra.mxu1 %v5514_v6  ;;  %3467 = vmatpush1.bf16.msra.mxu0 %v5517_v7  ;;  %v5591_v6 = vld [vmem:[#allocation7 + $0x4c] ss:$16 sps:$4 sm:$0xff]   ;;  %v5586_v7 = vld [vmem:[#allocation7 + $0x40] ss:$16 sps:$4 sm:$0xff]  }
 0x22e   :  { %3402 = vmatprep.subr.bf16.mxu1 %v5522_v28  ;;  %3468 = vmatprep.subr.bf16.mxu0 %v5525_v51  ;;  %v5589_v28 = vld [vmem:[#allocation7 + $0x48] ss:$16 sps:$4 sm:$0xff]   ;;  %v5594_v51 = vld [vmem:[#allocation7 + $0x64] ss:$16 sps:$4 sm:$0xff]  }
 0x231   :  { %3403 = vmatpush1.bf16.msra.mxu1 %v5520_v8  ;;  %3469 = vmatpush1.bf16.msra.mxu0 %v5523_v9  ;;  %v5597_v8 = vld [vmem:[#allocation7 + $0x6c] ss:$16 sps:$4 sm:$0xff]   ;;  %v5592_v9 = vld [vmem:[#allocation7 + $0x60] ss:$16 sps:$4 sm:$0xff]  }
 0x232   :  { %3470 = vmatprep.subr.bf16.mxu0 %v5528_v52  ;;  %3495 = vmatprep.subr.bf16.mxu1 %v5531_v61  ;;  %v5603_v52 = vld [vmem:[#allocation7 + $0x8c] ss:$16 sps:$4 sm:$0xff]   ;;  %v5598_v61 = vld [vmem:[#allocation7 + $0x80] ss:$16 sps:$4 sm:$0xff]  }
 0x234   :  { %3405 = vmatmul.mubr.bf16.vlgmr.msra.gmra.mrb[32].mxu1 %v6219_v11 }
 0x235   :  { %3471 = vmatpush1.bf16.msra.mxu0 %v5526_v49  ;;  %3496 = vmatpush1.bf16.msra.mxu1 %v5529_v58  ;;  %v5606_v49 = vld [vmem:[#allocation7 + $0xa4] ss:$16 sps:$4 sm:$0xff]   ;;  %v5609_v58 = vld [vmem:[#allocation7 + $0xac] ss:$16 sps:$4 sm:$0xff]  }
 0x236   :  { %3472 = vmatprep.subr.bf16.mxu0 %v5534_v12  ;;  %3497 = vmatprep.subr.bf16.mxu1 %v5537_v13  ;;  %v5604_v12 = vld [vmem:[#allocation7 + $0xa0] ss:$16 sps:$4 sm:$0xff]   ;;  %v5607_v13 = vld [vmem:[#allocation7 + $0xa8] ss:$16 sps:$4 sm:$0xff]  }
 0x237   :  { %3527 = vmatprep.mubr.bf16.mxu1 %v5867_v26  ;;  %v5553_v26 = vld [vmem:[#allocation5 + $0x288] ss:$16 sps:$4 sm:$0xff]  }
 0x239   :  { %3473 = vmatpush1.bf16.msra.mxu0 %v5532_v14  ;;  %3498 = vmatpush1.bf16.msra.mxu1 %v5535_v15  ;;  %v5612_v14 = vld [vmem:[#allocation7 + $0xc4] ss:$16 sps:$4 sm:$0xff]   ;;  %v5615_v15 = vld [vmem:[#allocation7 + $0xcc] ss:$16 sps:$4 sm:$0xff]  }
 0x23a   :  { %3474 = vmatprep.subr.bf16.mxu0 %v5540_v16  ;;  %3499 = vmatprep.subr.bf16.mxu1 %v5543_v17  ;;  %v5610_v16 = vld [vmem:[#allocation7 + $0xc0] ss:$16 sps:$4 sm:$0xff]   ;;  %v5613_v17 = vld [vmem:[#allocation7 + $0xc8] ss:$16 sps:$4 sm:$0xff]  }
 0x23d   :  { %3475 = vmatpush1.bf16.msra.mxu0 %v5538_v18  ;;  %3500 = vmatpush1.bf16.msra.mxu1 %v5541_v19  ;;  %v5618_v18 = vld [vmem:[#allocation7 + $0xe4] ss:$16 sps:$4 sm:$0xff]   ;;  %v5621_v19 = vld [vmem:[#allocation7 + $0xec] ss:$16 sps:$4 sm:$0xff]  }
 0x23e   :  { %3476 = vmatprep.subr.bf16.mxu0 %v5546_v20  ;;  %3501 = vmatprep.subr.bf16.mxu1 %v5549_v25  ;;  %v5616_v20 = vld [vmem:[#allocation7 + $0xe0] ss:$16 sps:$4 sm:$0xff]   ;;  %v5619_v25 = vld [vmem:[#allocation7 + $0xe8] ss:$16 sps:$4 sm:$0xff]  }
 0x241   :  { %3477 = vmatpush1.bf16.msra.mxu0 %v5544_v27  ;;  %3502 = vmatpush1.bf16.msra.mxu1 %v5547_v29  ;;  %v5624_v27 = vld [vmem:[#allocation7 + $0x104] ss:$16 sps:$4 sm:$0xff]   ;;  %v5627_v29 = vld [vmem:[#allocation7 + $0x10c] ss:$16 sps:$4 sm:$0xff]  }
 0x242   :  { %3478 = vmatprep.subr.bf16.mxu0 %v5552_v30  ;;  %3503 = vmatprep.subr.bf16.mxu1 %v5555_v31  ;;  %v5622_v30 = vld [vmem:[#allocation7 + $0x100] ss:$16 sps:$4 sm:$0xff]   ;;  %v5625_v31 = vld [vmem:[#allocation7 + $0x108] ss:$16 sps:$4 sm:$0xff]  }
 0x245   :  { %3479 = vmatpush1.bf16.msra.mxu0 %v5550_v32  ;;  %3504 = vmatpush1.bf16.msra.mxu1 %v5553_v26  ;;  %v5630_v32 = vld [vmem:[#allocation7 + $0x124] ss:$16 sps:$4 sm:$0xff]   ;;  %v5633_v26 = vld [vmem:[#allocation7 + $0x12c] ss:$16 sps:$4 sm:$0xff]  }
 0x246   :  { %3480 = vmatprep.subr.bf16.mxu0 %v5558_v33  ;;  %3505 = vmatprep.subr.bf16.mxu1 %v5561_v34  ;;  %v5628_v33 = vld [vmem:[#allocation7 + $0x120] ss:$16 sps:$4 sm:$0xff]   ;;  %v5631_v34 = vld [vmem:[#allocation7 + $0x128] ss:$16 sps:$4 sm:$0xff]  }
 0x247   :  { %v2578_v39 = vpop.f32.mrb[20].mxu1  ;;  %v2619_v41 = vpop.f32.mrb[20].mxu0 }
 0x248   :  { %v2579_v42 = vadd.f32 %v2578_v39, %v6201_v21  ;;  %v2580_v43 = vpop.f32.mrb[21].mxu1  ;;  %v2621_v44 = vpop.f32.mrb[21].mxu0  ;;  %v5568_v21 = vld [vmem:[#allocation5 + $0x1e8] ss:$16 sps:$4 sm:$0xff]   ;;  %v5642_v39 = vld [vmem:[#allocation7 + $0x164] ss:$16 sps:$4 sm:$0xff]  }
 0x249   :  { %v2581_v45 = vadd.f32 %v2580_v43, %v6205_v23  ;;  %v2582_v46 = vpop.f32.mrb[22].mxu1  ;;  %3481 = vmatpush1.bf16.msra.mxu0 %v5556_v35  ;;  %3506 = vmatpush1.bf16.msra.mxu1 %v5559_v36  ;;  %v2623_v50 = vpop.f32.mrb[22].mxu0  ;;  %v5571_v23 = vld [vmem:[#allocation5 + $0x2e8] ss:$16 sps:$4 sm:$0xff]   ;;  %v5636_v35 = vld [vmem:[#allocation7 + $0x144] ss:$16 sps:$4 sm:$0xff]  }
 0x24a   :  { %v6225_v53 = vadd.f32 %v2619_v41, %v2579_v42  ;;  %v2583_v54 = vpop.f32.mrb[23].mxu1  ;;  %3482 = vmatprep.subr.bf16.mxu0 %v5564_v37  ;;  %3507 = vmatprep.subr.bf16.mxu1 %v5567_v38  ;;  %v2624_v57 = vpop.f32.mrb[23].mxu0  ;;  %v5639_v36 = vld [vmem:[#allocation7 + $0x14c] ss:$16 sps:$4 sm:$0xff]   ;;  %v5634_v37 = vld [vmem:[#allocation7 + $0x140] ss:$16 sps:$4 sm:$0xff]  }
 0x24b   :  { %v6227_v59 = vadd.f32 %v2621_v44, %v2581_v45  ;;  %v5637_v38 = vld [vmem:[#allocation7 + $0x148] ss:$16 sps:$4 sm:$0xff]   ;;  %v5645_v41 = vld [vmem:[#allocation7 + $0x16c] ss:$16 sps:$4 sm:$0xff]   ;;  %v5640_v42 = vld [vmem:[#allocation7 + $0x160] ss:$16 sps:$4 sm:$0xff]  }
 0x24c   :  { %v5643_v43 = vld [vmem:[#allocation7 + $0x168] ss:$16 sps:$4 sm:$0xff]   ;;  %v5648_v44 = vld [vmem:[#allocation7 + $0x184] ss:$16 sps:$4 sm:$0xff]   ;;  %v5651_v45 = vld [vmem:[#allocation7 + $0x18c] ss:$16 sps:$4 sm:$0xff]  }
 0x24d   :  { %3483 = vmatpush1.bf16.msra.mxu0 %v5562_v47  ;;  %3508 = vmatpush1.bf16.msra.mxu1 %v5565_v48  ;;  %v5646_v46 = vld [vmem:[#allocation7 + $0x180] ss:$16 sps:$4 sm:$0xff]   ;;  %v5649_v47 = vld [vmem:[#allocation7 + $0x188] ss:$16 sps:$4 sm:$0xff]   ;;  %v5654_v48 = vld [vmem:[#allocation7 + $0x1a4] ss:$16 sps:$4 sm:$0xff]  }
 0x24e   :  { %3484 = vmatprep.subr.bf16.mxu0 %v5570_v55  ;;  %3509 = vmatprep.subr.bf16.mxu1 %v5573_v56  ;;  %v5657_v50 = vld [vmem:[#allocation7 + $0x1ac] ss:$16 sps:$4 sm:$0xff]   ;;  %v5652_v54 = vld [vmem:[#allocation7 + $0x1a0] ss:$16 sps:$4 sm:$0xff]   ;;  %v5655_v55 = vld [vmem:[#allocation7 + $0x1a8] ss:$16 sps:$4 sm:$0xff]  }
 0x251   :  { %3485 = vmatpush1.bf16.msra.mxu0 %v5568_v21  ;;  %3510 = vmatpush1.bf16.msra.mxu1 %v5571_v23 }
 0x252   :  { %4364 = vmatprep.subr.bf16.mxu1 %v5576_v60  ;;  %4446 = vmatprep.subr.bf16.mxu0 %v5579_v62 }
 0x254   :  { %3487 = vmatmul.mubr.bf16.vlgmr.msra.gmra.mrb[36].mxu0 %v6219_v11  ;;  %3528 = vmatmul.mubr.bf16.vlgmr.msra.gmra.mrb[36].mxu1 %v6212_v40  ;;  %v5595_v40 = vld [vmem:[#allocation7 + $0x68] ss:$16 sps:$4 sm:$0xff]  }
 0x255   :  { %4365 = vmatpush1.bf16.msra.mxu1 %v5574_v63  ;;  %4447 = vmatpush1.bf16.msra.mxu0 %v5577_v0  ;;  %v5601_v11 = vld [vmem:[#allocation7 + $0x88] ss:$16 sps:$4 sm:$0xff]  }
 0x256   :  { %4366 = vmatprep.subr.bf16.mxu1 %v5582_v1  ;;  %4448 = vmatprep.subr.bf16.mxu0 %v5585_v2 }
 0x259   :  { %4367 = vmatpush1.bf16.msra.mxu1 %v5580_v3  ;;  %4449 = vmatpush1.bf16.msra.mxu0 %v5583_v4 }
 0x25a   :  { %4368 = vmatprep.subr.bf16.mxu1 %v5588_v5  ;;  %4450 = vmatprep.subr.bf16.mxu0 %v5591_v6  ;;  %v5658_v5 = vld [vmem:[#allocation7 + $0x1c0] ss:$16 sps:$4 sm:$0xff]   ;;  %v5660_v6 = vld [vmem:[#allocation7 + $0x1c4] ss:$16 sps:$4 sm:$0xff]  }
 0x25d   :  { %4369 = vmatpush1.bf16.msra.mxu1 %v5586_v7  ;;  %4451 = vmatpush1.bf16.msra.mxu0 %v5589_v28  ;;  %v5661_v7 = vld [vmem:[#allocation7 + $0x1c8] ss:$16 sps:$4 sm:$0xff]   ;;  %v5663_v28 = vld [vmem:[#allocation7 + $0x1cc] ss:$16 sps:$4 sm:$0xff]  }
 0x25e   :  { %4370 = vmatprep.subr.bf16.mxu1 %v5594_v51  ;;  %4452 = vmatprep.subr.bf16.mxu0 %v5597_v8  ;;  %v5664_v51 = vld [vmem:[#allocation7 + $0x1e0] ss:$16 sps:$4 sm:$0xff]   ;;  %v5675_v8 = vld [vmem:[#allocation7 + $0x20c] ss:$16 sps:$4 sm:$0xff]  }
 0x261   :  { %4371 = vmatpush1.bf16.msra.mxu1 %v5592_v9  ;;  %4453 = vmatpush1.bf16.msra.mxu0 %v5595_v40 }
 0x262   :  { %4372 = vmatprep.subr.bf16.mxu1 %v5600_v10  ;;  %4454 = vmatprep.subr.bf16.mxu0 %v5603_v52 }
 0x265   :  { %4373 = vmatpush1.bf16.msra.mxu1 %v5598_v61  ;;  %4455 = vmatpush1.bf16.msra.mxu0 %v5601_v11 }
 0x266   :  { %4374 = vmatprep.subr.bf16.mxu1 %v5606_v49  ;;  %4456 = vmatprep.subr.bf16.mxu0 %v5609_v58 }
 0x269   :  { %4375 = vmatpush1.bf16.msra.mxu1 %v5604_v12  ;;  %4457 = vmatpush1.bf16.msra.mxu0 %v5607_v13 }
 0x26a   :  { %4376 = vmatprep.subr.bf16.mxu1 %v5612_v14  ;;  %4458 = vmatprep.subr.bf16.mxu0 %v5615_v15 }
 0x26d   :  { %4377 = vmatpush1.bf16.msra.mxu1 %v5610_v16  ;;  %4459 = vmatpush1.bf16.msra.mxu0 %v5613_v17 }
 0x26e   :  { %4378 = vmatprep.subr.bf16.mxu1 %v5618_v18  ;;  %4460 = vmatprep.subr.bf16.mxu0 %v5621_v19 }
 0x271   :  { %4379 = vmatpush1.bf16.msra.mxu1 %v5616_v20  ;;  %4461 = vmatpush1.bf16.msra.mxu0 %v5619_v25  ;;  %v3542_v20 = vlaneseq }
 0x272   :  { %4380 = vmatprep.subr.bf16.mxu1 %v5624_v27  ;;  %4462 = vmatprep.subr.bf16.mxu0 %v5627_v29  ;;  %v6245_v29 = vld [vmem:[%s6298_s8] sm:$0xf] }
 0x273   :  { %v6239_v25 = vshrl.u32 %v3542_v20, 7 }
 0x275   :  { %4381 = vmatpush1.bf16.msra.mxu1 %v5622_v30  ;;  %4463 = vmatpush1.bf16.msra.mxu0 %v5625_v31  ;;  %v3544_v27 = vsub.s32 0, %v6239_v25  ;;  %v3548_v30 = vsub.s32 1, %v6239_v25 }
 0x276   :  { %4382 = vmatprep.subr.bf16.mxu1 %v5630_v32  ;;  %4464 = vmatprep.subr.bf16.mxu0 %v5633_v26 }
 0x277   :  { %v3545_v26 = vrot.slane %v6245_v29, %v3544_v27 }
 0x279   :  { %4383 = vmatpush1.bf16.msra.mxu1 %v5628_v33  ;;  %4465 = vmatpush1.bf16.msra.mxu0 %v5631_v34 }
 0x27a   :  { %4384 = vmatprep.subr.bf16.mxu1 %v5636_v35  ;;  %4466 = vmatprep.subr.bf16.mxu0 %v5639_v36  ;;  %v3549_v35 = vrot.slane %v6245_v29, %v3548_v30 }
 0x27d   :  { %4385 = vmatpush1.bf16.msra.mxu1 %v5634_v37  ;;  %4467 = vmatpush1.bf16.msra.mxu0 %v5637_v38 }
 0x27e   :  { %4386 = vmatprep.subr.bf16.mxu1 %v5642_v39  ;;  %4468 = vmatprep.subr.bf16.mxu0 %v5645_v41 }
 0x281   :  { %4387 = vmatpush1.bf16.msra.mxu1 %v5640_v42  ;;  %4469 = vmatpush1.bf16.msra.mxu0 %v5643_v43 }
 0x282   :  { %4388 = vmatprep.subr.bf16.mxu1 %v5648_v44  ;;  %4470 = vmatprep.subr.bf16.mxu0 %v5651_v45 }
 0x285   :  { %4389 = vmatpush1.bf16.msra.mxu1 %v5646_v46  ;;  %4471 = vmatpush1.bf16.msra.mxu0 %v5649_v47  ;;  %v5670_v46 = vld [vmem:[#allocation7 + $0x200] ss:$16 sps:$4 sm:$0xff]   ;;  %v5673_v47 = vld [vmem:[#allocation7 + $0x208] ss:$16 sps:$4 sm:$0xff]  }
 0x286   :  { %4390 = vmatprep.subr.bf16.mxu1 %v5654_v48  ;;  %4472 = vmatprep.subr.bf16.mxu0 %v5657_v50  ;;  %v5678_v50 = vld [vmem:[#allocation7 + $0x224] ss:$16 sps:$4 sm:$0xff]  }
 0x287   :  { %v2660_v56 = vpop.f32.mrb[24].mxu1  ;;  %v2701_v57 = vpop.f32.mrb[24].mxu0 }
 0x288   :  { %v2661_v21 = vadd.f32 %v2660_v56, %v6225_v53  ;;  %v2702_v23 = vadd.f32 %v2701_v57, %v6203_v22  ;;  %v2662_v60 = vpop.f32.mrb[25].mxu1  ;;  %v2703_v62 = vpop.f32.mrb[25].mxu0  ;;  %v5666_v22 = vld [vmem:[#allocation7 + $0x1e4] ss:$16 sps:$4 sm:$0xff]   ;;  %v5669_v53 = vld [vmem:[#allocation7 + $0x1ec] ss:$16 sps:$4 sm:$0xff]  }
 0x289   :  { %v2663_v63 = vadd.f32 %v2662_v60, %v6227_v59  ;;  %v2704_v0 = vadd.f32 %v2703_v62, %v6207_v24  ;;  %v2664_v1 = vpop.f32.mrb[26].mxu1  ;;  %v2705_v2 = vpop.f32.mrb[26].mxu0  ;;  %4391 = vmatpush1.bf16.msra.mxu1 %v5652_v54  ;;  %4473 = vmatpush1.bf16.msra.mxu0 %v5655_v55  ;;  %v5667_v59 = vld [vmem:[#allocation7 + $0x1e8] ss:$16 sps:$4 sm:$0xff]   ;;  %v5672_v24 = vld [vmem:[#allocation7 + $0x204] ss:$16 sps:$4 sm:$0xff]  }
 0x28a   :  { %v2665_v3 = vpop.f32.mrb[27].mxu1  ;;  %v2706_v4 = vpop.f32.mrb[27].mxu0  ;;  %4392 = vmatprep.subr.bf16.mxu1 %v5660_v6  ;;  %4474 = vmatprep.subr.bf16.mxu0 %v5663_v28  ;;  %v5681_v54 = vld [vmem:[#allocation7 + $0x22c] ss:$16 sps:$4 sm:$0xff]   ;;  %v5676_v55 = vld [vmem:[#allocation7 + $0x220] ss:$16 sps:$4 sm:$0xff]  }
 0x28b   :  { %v5679_v56 = vld [vmem:[#allocation7 + $0x228] ss:$16 sps:$4 sm:$0xff]   ;;  %v5684_v57 = vld [vmem:[#allocation7 + $0x244] ss:$16 sps:$4 sm:$0xff]   ;;  %v5699_v3 = vld [vmem:[#allocation7 + $0x28c] ss:$16 sps:$4 sm:$0xff]  }
 0x28c   :  { %v5685_v60 = vld [vmem:[#allocation7 + $0x248] ss:$16 sps:$4 sm:$0xff]   ;;  %v5690_v62 = vld [vmem:[#allocation7 + $0x264] ss:$16 sps:$4 sm:$0xff]   ;;  %v5694_v4 = vld [vmem:[#allocation7 + $0x280] ss:$16 sps:$4 sm:$0xff]  }
 0x28d   :  { %4393 = vmatpush1.bf16.msra.mxu1 %v5658_v5  ;;  %4475 = vmatpush1.bf16.msra.mxu0 %v5661_v7  ;;  %v5691_v1 = vld [vmem:[#allocation7 + $0x268] ss:$16 sps:$4 sm:$0xff]   ;;  %v5696_v2 = vld [vmem:[#allocation7 + $0x284] ss:$16 sps:$4 sm:$0xff]   ;;  %v5705_v7 = vld [vmem:[#allocation7 + $0x2ac] ss:$16 sps:$4 sm:$0xff]  }
 0x28e   :  { %4394 = vmatprep.subr.bf16.mxu1 %v5666_v22  ;;  %4476 = vmatprep.subr.bf16.mxu0 %v5669_v53  ;;  %v5697_v5 = vld [vmem:[#allocation7 + $0x288] ss:$16 sps:$4 sm:$0xff]   ;;  %v5702_v6 = vld [vmem:[#allocation7 + $0x2a4] ss:$16 sps:$4 sm:$0xff]   ;;  %v3552_v28 = vsub.s32 2, %v6239_v25 }
 0x28f   :  { %v5700_v22 = vld [vmem:[#allocation7 + $0x2a0] ss:$16 sps:$4 sm:$0xff]   ;;  %v5703_v53 = vld [vmem:[#allocation7 + $0x2a8] ss:$16 sps:$4 sm:$0xff]  }
 0x291   :  { %4395 = vmatpush1.bf16.msra.mxu1 %v5664_v51  ;;  %4477 = vmatpush1.bf16.msra.mxu0 %v5667_v59  ;;  %v3556_v51 = vsub.s32 3, %v6239_v25  ;;  %v5708_v59 = vld [vmem:[#allocation7 + $0x2c4] ss:$16 sps:$4 sm:$0xff]  }
 0x292   :  { %4405 = vmatprep.subr.bf16.mxu1 %v5672_v24  ;;  %4487 = vmatprep.subr.bf16.mxu0 %v5675_v8  ;;  %v5711_v24 = vld [vmem:[#allocation7 + $0x2cc] ss:$16 sps:$4 sm:$0xff]  }
 0x2c7   :  { %v2742_v9 = vpop.f32.mrb[28].mxu1  ;;  %v2783_v40 = vpop.f32.mrb[28].mxu0 }
 0x2c8   :  { %v2743_v10 = vadd.f32 %v2742_v9, %v2702_v23  ;;  %v2744_v52 = vpop.f32.mrb[29].mxu1  ;;  %v2785_v61 = vpop.f32.mrb[29].mxu0  ;;  %v5682_v23 = vld [vmem:[#allocation7 + $0x240] ss:$16 sps:$4 sm:$0xff]  }
 0x2c9   :  { %v2745_v11 = vadd.f32 %v2744_v52, %v2704_v0  ;;  %v2746_v49 = vpop.f32.mrb[30].mxu1  ;;  %v2787_v58 = vpop.f32.mrb[30].mxu0  ;;  %v5688_v0 = vld [vmem:[#allocation7 + $0x260] ss:$16 sps:$4 sm:$0xff]  }
 0x2ca   :  { %v6235_v12 = vadd.f32 %v2783_v40, %v2743_v10  ;;  %v2747_v13 = vpop.f32.mrb[31].mxu1  ;;  %v2788_v14 = vpop.f32.mrb[31].mxu0  ;;  %v3553_v10 = vrot.slane %v6245_v29, %v3552_v28  ;;  %v3557_v49 = vrot.slane %v6245_v29, %v3556_v51  ;;  %v5706_v58 = vld [vmem:[#allocation7 + $0x2c0] ss:$16 sps:$4 sm:$0xff]  }
 0x2cb   :  { %v6237_v15 = vadd.f32 %v2785_v61, %v2745_v11  ;;  %v5709_v13 = vld [vmem:[#allocation7 + $0x2c8] ss:$16 sps:$4 sm:$0xff]   ;;  %v5712_v29 = vld [vmem:[#allocation7 + $0x2e0] ss:$16 sps:$4 sm:$0xff]  }
 0x2e7   :  { %v3447_v16 = vpop.f32.mrb[32].mxu0 }
 0x2e8   :  { %v3449_v17 = vpop.f32.mrb[33].mxu0 }
 0x2e9   :  { %v3451_v18 = vpop.f32.mrb[34].mxu0 }
 0x2ea   :  { %v3452_v19 = vpop.f32.mrb[35].mxu0  ;;  %v5714_v18 = vld [vmem:[#allocation7 + $0x2e4] ss:$16 sps:$4 sm:$0xff]  }
 0x2eb   :  { %v5717_v19 = vld [vmem:[#allocation7 + $0x2ec] ss:$16 sps:$4 sm:$0xff]  }
 0x307   :  { %v3406_v31 = vpop.f32.mrb[32].mxu1 }
 0x308   :  { %v3448_v32 = vadd.f32 %v3447_v16, %v3406_v31  ;;  %v3408_v33 = vpop.f32.mrb[33].mxu1 }
 0x309   :  { %v3450_v34 = vadd.f32 %v3449_v17, %v3408_v33  ;;  %v3410_v36 = vpop.f32.mrb[34].mxu1 }
 0x30a   :  { %v3536_v37 = vadd.f32 %v3448_v32, %v2661_v21  ;;  %v3411_v38 = vpop.f32.mrb[35].mxu1  ;;  %v5687_v21 = vld [vmem:[#allocation7 + $0x24c] ss:$16 sps:$4 sm:$0xff]  }
 0x30b   :  { %v3537_v39 = vadd.f32 %v3450_v34, %v2663_v63  ;;  %v5693_v63 = vld [vmem:[#allocation7 + $0x26c] ss:$16 sps:$4 sm:$0xff]   ;;  %v5715_v34 = vld [vmem:[#allocation7 + $0x2e8] ss:$16 sps:$4 sm:$0xff]  }
 0x30c   :  { %v3562_v41 = vadd.f32 %v3545_v26, %v3536_v37  ;;  %v5723_v36 = vld [vmem:[#allocation7 + $0x30c] ss:$16 sps:$4 sm:$0xff]   ;;  %v5718_v37 = vld [vmem:[#allocation7 + $0x300] ss:$16 sps:$4 sm:$0xff]  }
 0x30d   :  { %v3563_v42 = vadd.f32 %v3549_v35, %v3537_v39  ;;  %v5720_v35 = vld [vmem:[#allocation7 + $0x304] ss:$16 sps:$4 sm:$0xff]   ;;  %v5721_v39 = vld [vmem:[#allocation7 + $0x308] ss:$16 sps:$4 sm:$0xff]  }
 0x30e   :  { %v3566_v43 = vmax.f32 %v3562_v41, 0.0  ;;  %v5729_v41 = vld [vmem:[#allocation7 + $0x32c] ss:$16 sps:$4 sm:$0xff]  }
 0x30f   :  { %v3567_v44 = vmax.f32 %v3563_v42, 0.0  ;;  %v5724_v42 = vld [vmem:[#allocation7 + $0x320] ss:$16 sps:$4 sm:$0xff]  }
 0x310   :  { %v3570_v48 = vpack.c.bf16 %v3566_v43, %v3566_v43  ;;  %v5727_v43 = vld [vmem:[#allocation7 + $0x328] ss:$16 sps:$4 sm:$0xff]  }
 0x311   :  { %v3571_v45 = vpack.c.bf16 %v3567_v44, %v3567_v44  ;;  %v5732_v44 = vld [vmem:[#allocation7 + $0x344] ss:$16 sps:$4 sm:$0xff]  }
 0x313   :  { %4396 = vmatprep.mubr.bf16.mxu1 %v3571_v45  ;;  %4478 = vmatprep.mubr.bf16.mxu0 %v3571_v45  ;;  %v5735_v45 = vld [vmem:[#allocation7 + $0x34c] ss:$16 sps:$4 sm:$0xff]  }
 0x314   :  { %4397 = vmatmul.mubr.bf16.vlgmr.msra.gmra.mrb[40].mxu1 %v3570_v48  ;;  %4479 = vmatmul.mubr.bf16.vlgmr.msra.gmra.mrb[40].mxu0 %v3570_v48  ;;  %v5738_v48 = vld [vmem:[#allocation7 + $0x364] ss:$16 sps:$4 sm:$0xff]  }
 0x315   :  { %4406 = vmatpush1.bf16.msra.mxu1 %v5670_v46  ;;  %4488 = vmatpush1.bf16.msra.mxu0 %v5673_v47  ;;  %v5730_v46 = vld [vmem:[#allocation7 + $0x340] ss:$16 sps:$4 sm:$0xff]   ;;  %v5733_v47 = vld [vmem:[#allocation7 + $0x348] ss:$16 sps:$4 sm:$0xff]  }
 0x316   :  { %4407 = vmatprep.subr.bf16.mxu1 %v5678_v50  ;;  %4489 = vmatprep.subr.bf16.mxu0 %v5681_v54  ;;  %v5741_v50 = vld [vmem:[#allocation7 + $0x36c] ss:$16 sps:$4 sm:$0xff]   ;;  %v5736_v54 = vld [vmem:[#allocation7 + $0x360] ss:$16 sps:$4 sm:$0xff]  }
 0x319   :  { %4408 = vmatpush1.bf16.msra.mxu1 %v5676_v55  ;;  %4490 = vmatpush1.bf16.msra.mxu0 %v5679_v56  ;;  %v5739_v55 = vld [vmem:[#allocation7 + $0x368] ss:$16 sps:$4 sm:$0xff]   ;;  %v5744_v56 = vld [vmem:[#allocation7 + $0x384] ss:$16 sps:$4 sm:$0xff]  }
 0x31a   :  { %4409 = vmatprep.subr.bf16.mxu1 %v5684_v57  ;;  %4491 = vmatprep.subr.bf16.mxu0 %v5687_v21  ;;  %v5747_v57 = vld [vmem:[#allocation7 + $0x38c] ss:$16 sps:$4 sm:$0xff]   ;;  %v5742_v21 = vld [vmem:[#allocation7 + $0x380] ss:$16 sps:$4 sm:$0xff]  }
 0x31d   :  { %4410 = vmatpush1.bf16.msra.mxu1 %v5682_v23  ;;  %4492 = vmatpush1.bf16.msra.mxu0 %v5685_v60  ;;  %v5745_v23 = vld [vmem:[#allocation7 + $0x388] ss:$16 sps:$4 sm:$0xff]   ;;  %v5750_v60 = vld [vmem:[#allocation7 + $0x3a4] ss:$16 sps:$4 sm:$0xff]  }
 0x31e   :  { %4411 = vmatprep.subr.bf16.mxu1 %v5690_v62  ;;  %4493 = vmatprep.subr.bf16.mxu0 %v5693_v63  ;;  %v5753_v62 = vld [vmem:[#allocation7 + $0x3ac] ss:$16 sps:$4 sm:$0xff]   ;;  %v5748_v63 = vld [vmem:[#allocation7 + $0x3a0] ss:$16 sps:$4 sm:$0xff]  }
 0x321   :  { %4412 = vmatpush1.bf16.msra.mxu1 %v5688_v0  ;;  %4494 = vmatpush1.bf16.msra.mxu0 %v5691_v1  ;;  %v5751_v0 = vld [vmem:[#allocation7 + $0x3a8] ss:$16 sps:$4 sm:$0xff]   ;;  %v5756_v1 = vld [vmem:[#allocation7 + $0x3c4] ss:$16 sps:$4 sm:$0xff]  }
 0x322   :  { %4413 = vmatprep.subr.bf16.mxu1 %v5696_v2  ;;  %4495 = vmatprep.subr.bf16.mxu0 %v5699_v3  ;;  %v5759_v2 = vld [vmem:[#allocation7 + $0x3cc] ss:$16 sps:$4 sm:$0xff]   ;;  %v5754_v3 = vld [vmem:[#allocation7 + $0x3c0] ss:$16 sps:$4 sm:$0xff]  }
 0x325   :  { %4414 = vmatpush1.bf16.msra.mxu1 %v5694_v4  ;;  %4496 = vmatpush1.bf16.msra.mxu0 %v5697_v5  ;;  %v5757_v4 = vld [vmem:[#allocation7 + $0x3c8] ss:$16 sps:$4 sm:$0xff]   ;;  %v5762_v5 = vld [vmem:[#allocation7 + $0x3e4] ss:$16 sps:$4 sm:$0xff]  }
 0x326   :  { %4415 = vmatprep.subr.bf16.mxu1 %v5702_v6  ;;  %4497 = vmatprep.subr.bf16.mxu0 %v5705_v7  ;;  %v5765_v6 = vld [vmem:[#allocation7 + $0x3ec] ss:$16 sps:$4 sm:$0xff]   ;;  %v5760_v7 = vld [vmem:[#allocation7 + $0x3e0] ss:$16 sps:$4 sm:$0xff]  }
 0x327   :  { %v3488_v8 = vpop.f32.mrb[36].mxu0  ;;  %v3529_v9 = vpop.f32.mrb[36].mxu1 }
 0x328   :  { %v3530_v40 = vadd.f32 %v3529_v9, %v3488_v8  ;;  %v3490_v52 = vpop.f32.mrb[37].mxu0  ;;  %v3531_v61 = vpop.f32.mrb[37].mxu1 }
 0x329   :  { %v3532_v11 = vadd.f32 %v3531_v61, %v3490_v52  ;;  %4416 = vmatpush1.bf16.msra.mxu1 %v5700_v22  ;;  %4498 = vmatpush1.bf16.msra.mxu0 %v5703_v53  ;;  %v3492_v14 = vpop.f32.mrb[38].mxu0  ;;  %v3533_v16 = vpop.f32.mrb[38].mxu1  ;;  %v5763_v22 = vld [vmem:[#allocation7 + $0x3e8] ss:$16 sps:$4 sm:$0xff]  }
 0x32a   :  { %v3538_v17 = vadd.f32 %v3530_v40, %v6235_v12  ;;  %4417 = vmatprep.subr.bf16.mxu1 %v5708_v59  ;;  %4499 = vmatprep.subr.bf16.mxu0 %v5711_v24  ;;  %v3493_v20 = vpop.f32.mrb[39].mxu0  ;;  %v3534_v31 = vpop.f32.mrb[39].mxu1  ;;  %v3702_v24 = vld [vmem:[%s6300_s10] sm:$0xf]  ;;  %s5832_s10 = scalar_lea.vmem %s4539_s16, 512 }
 0x32b   :  { %v3539_v32 = vadd.f32 %v3532_v11, %v6237_v15  ;;  %v5726_v15 = vld [vmem:[#allocation7 + $0x324] ss:$16 sps:$4 sm:$0xff]   ;;  %v3707_v8 = vrot.slane %v3702_v24, %v3544_v27  ;;  %v3715_v9 = vrot.slane %v3702_v24, %v3552_v28  ;;  %v3711_v40 = vrot.slane %v3702_v24, %v3548_v30  ;;  %p5833_p10 = scmp.ne.s32.totalorder %s4539_s16, %s5832_s10  ;;  %p5838_p12 = scmp.lt.s32.totalorder %s5832_s10, %s5832_s10 }
 0x32c   :  { %v6264_v26 = vadd.f32 %v3553_v10, %v3538_v17  ;;  %v3719_v10 = vrot.slane %v3702_v24, %v3556_v51 }
 0x32d   :  { %v3565_v33 = vadd.f32 %v3557_v49, %v3539_v32  ;;  %4418 = vmatpush1.bf16.msra.mxu1 %v5706_v58  ;;  %4500 = vmatpush1.bf16.msra.mxu0 %v5709_v13  ;;  %p5839_p13 = por %p5838_p12, %p5837_p11 }
 0x32e   :  { %4419 = vmatprep.subr.bf16.mxu1 %v5714_v18  ;;  %4501 = vmatprep.subr.bf16.mxu0 %v5717_v19  ;;  %v3568_v53 = vmax.f32 %v6264_v26, 0.0 }
 0x32f   :  { %v3569_v12 = vmax.f32 %v3565_v33, 0.0  ;;  %p5840_p0 = pnand %p5839_p13, %p5833_p10 }
 0x330   :  { %v3572_v59 = vpack.c.bf16 %v3568_v53, %v3568_v53 }
 0x331   :  { %4420 = vmatpush1.bf16.msra.mxu1 %v5712_v29  ;;  %4502 = vmatpush1.bf16.msra.mxu0 %v5715_v34  ;;  %v3573_v38 = vpack.c.bf16 %v3569_v12, %v3569_v12 }
 0x332   :  { %4421 = vmatprep.subr.bf16.mxu1 %v5720_v35  ;;  %4503 = vmatprep.subr.bf16.mxu0 %v5723_v36 }
 0x333   :  { %4437 = vmatprep.mubr.bf16.mxu1 %v3573_v38  ;;  %4519 = vmatprep.mubr.bf16.mxu0 %v3573_v38 }
 0x335   :  { %4422 = vmatpush1.bf16.msra.mxu1 %v5718_v37  ;;  %4504 = vmatpush1.bf16.msra.mxu0 %v5721_v39 }
 0x336   :  { %4423 = vmatprep.subr.bf16.mxu1 %v5726_v15  ;;  %4505 = vmatprep.subr.bf16.mxu0 %v5729_v41 }
 0x339   :  { %4424 = vmatpush1.bf16.msra.mxu1 %v5724_v42  ;;  %4506 = vmatpush1.bf16.msra.mxu0 %v5727_v43 }
 0x33a   :  { %4425 = vmatprep.subr.bf16.mxu1 %v5732_v44  ;;  %4507 = vmatprep.subr.bf16.mxu0 %v5735_v45 }
 0x33d   :  { %4426 = vmatpush1.bf16.msra.mxu1 %v5730_v46  ;;  %4508 = vmatpush1.bf16.msra.mxu0 %v5733_v47 }
 0x33e   :  { %4427 = vmatprep.subr.bf16.mxu1 %v5738_v48  ;;  %4509 = vmatprep.subr.bf16.mxu0 %v5741_v50 }
 0x341   :  { %4428 = vmatpush1.bf16.msra.mxu1 %v5736_v54  ;;  %4510 = vmatpush1.bf16.msra.mxu0 %v5739_v55 }
 0x342   :  { %4429 = vmatprep.subr.bf16.mxu1 %v5744_v56  ;;  %4511 = vmatprep.subr.bf16.mxu0 %v5747_v57 }
 0x345   :  { %4430 = vmatpush1.bf16.msra.mxu1 %v5742_v21  ;;  %4512 = vmatpush1.bf16.msra.mxu0 %v5745_v23 }
 0x346   :  { %4431 = vmatprep.subr.bf16.mxu1 %v5750_v60  ;;  %4513 = vmatprep.subr.bf16.mxu0 %v5753_v62 }
 0x349   :  { %4432 = vmatpush1.bf16.msra.mxu1 %v5748_v63  ;;  %4514 = vmatpush1.bf16.msra.mxu0 %v5751_v0 }
 0x34a   :  { %4433 = vmatprep.subr.bf16.mxu1 %v5756_v1  ;;  %4515 = vmatprep.subr.bf16.mxu0 %v5759_v2 }
 0x34d   :  { %4434 = vmatpush1.bf16.msra.mxu1 %v5754_v3  ;;  %4516 = vmatpush1.bf16.msra.mxu0 %v5757_v4 }
 0x34e   :  { %4435 = vmatprep.subr.bf16.mxu1 %v5762_v5  ;;  %4517 = vmatprep.subr.bf16.mxu0 %v5765_v6 }
 0x351   :  { %4436 = vmatpush1.bf16.msra.mxu1 %v5760_v7  ;;  %4518 = vmatpush1.bf16.msra.mxu0 %v5763_v22 }
 0x354   :  { %4438 = vmatmul.mubr.bf16.vlgmr.msra.gmra.mrb[40].mxu1 %v3572_v59  ;;  %4520 = vmatmul.mubr.bf16.vlgmr.msra.gmra.mrb[40].mxu0 %v3572_v59 }
 0x427   :  { %v4439_v52 = vpop.f32.mrb[40].mxu1  ;;  %v4521_v61 = vpop.f32.mrb[40].mxu0 }
 0x428   :  { %v5109_v11 = vadd.f32 %v4439_v52, %v3707_v8  ;;  %v5111_v49 = vadd.f32 %v4521_v61, %v3715_v9  ;;  %v4441_v58 = vpop.f32.mrb[41].mxu1  ;;  %v4523_v13 = vpop.f32.mrb[41].mxu0 }
 0x429   :  { %v5110_v14 = vadd.f32 %v4441_v58, %v3711_v40  ;;  %v5112_v16 = vadd.f32 %v4523_v13, %v3719_v10  ;;  %v4443_v27 = vpop.f32.mrb[42].mxu1  ;;  %v4525_v17 = vpop.f32.mrb[42].mxu0 }
 0x42a   :  { %4528 = vst [vmem:[#allocation8] sm:$0xff] %v5109_v11  ;;  %4530 = vst [vmem:[#allocation8 + $0x10] sm:$0xff] %v5111_v49  ;;  %v4444_v28 = vpop.f32.mrb[43].mxu1  ;;  %v4526_v30 = vpop.f32.mrb[43].mxu0 }
 0x42b   :  { %4529 = vst [vmem:[#allocation8 + $0x8] sm:$0xff] %v5110_v14  ;;  %4531 = vst [vmem:[#allocation8 + $0x18] sm:$0xff] %v5112_v16 }
 0x42c   :  { %5843 = shalt.err (!%p5840_p0)
}
 0x42d   :  { %s5844_s17 = scalar_lea.hbm %s6301_s11, 512 }
 0x42e   :  { %p5845_p1 = scmp.ne.s32.totalorder %s6301_s11, %s5844_s17  ;;  %p5848_p2 = scmp.lt.u32.totalorder %s5844_s17, %s6301_s11 }
 0x430   :  { %p5850_p3 = pnand %p5848_p2, %p5845_p1 }
 0x432   :  { %5853 = shalt.err (!%p5850_p3)
}
 0x433   :  { %4541 = dma.vmem_to_hbm [thread:$0]  %s4539_s16, 512, %s6301_s11, [#allocation4]  }
 0x434   :  { %5858 = dma.done.wait [#allocation4], 512  }
 0x435   :  { %5859 = vsyncadd [#allocation4], 4294966784 }
 0x436   :  { %4545 = vsyncpa [#allocation3], 1 }
 0x437   :  { %4546 = vsyncpa [#allocation6], 1 }
 0x438   :  { %4547 = vsyncpa [#allocation4], 1 }

</bundles_post_ra>
